<compile_context>
chip_gen: v7x
topology: tpu7x:2x2x1
jax: 0.10.0
libtpu: 0.0.40
codegen_flags: <defaults>
</compile_context>

<pallas_src>
import functools

import jax
import jax.numpy as jnp
import numpy as np
from jax import lax
from jax.experimental import pallas as pl
from jax.experimental.pallas import tpu as pltpu


# --------------------------------------------------------------------------
# VMEM capacity / honest footprint helpers
# --------------------------------------------------------------------------
def _vmem_capacity_bytes():
    try:
        cap = int(pltpu.get_tpu_info().vmem_capacity_bytes)
        if cap >= 32 * 1024 * 1024:
            return cap
    except Exception:
        pass
    return 64 * 1024 * 1024          # v7x-safe fallback


def _roundup(a, b):
    return -(-a // b) * b


def _vmem_bytes(shape, itemsize):
    """VMEM footprint of a block: lane dim padded to 128, sublane dim padded to
    the packing tile (8 for f32, 16 for bf16).  This is what makes the budget
    honest for small-Cin layers."""
    if len(shape) < 2:
        return _roundup(int(np.prod(shape)) * itemsize, 512)
    sub_tile = 8 * (4 // itemsize)
    lead = int(np.prod(shape[:-2])) if len(shape) > 2 else 1
    return lead * _roundup(shape[-2], sub_tile) * _roundup(shape[-1], 128) * itemsize


# --------------------------------------------------------------------------
# Pallas kernels
# --------------------------------------------------------------------------
def _conv_acc(a_ref, h_ref, w_ref, patch_ref, *, KH, KW, Cin, stride, th, Wo, fold):
    """Conv tile for one (Cout-tile, image, output-row-block) grid point.

    a_ref : (1, th*stride, Wp, Cin)  non-overlapping row block of padded NHWC x
    h_ref : (1, 1, hcnt, Wp, Cin)    halo rows just below the block
    w_ref : (KH*KW*Cin, tn)  [fold]  or (KH*KW, Cin, tn) [tap-wise]
    returns (th*Wo, tn) f32
    """
    rows = th * Wo
    # Full input window for this row block (A rows + halo rows).
    win = jnp.concatenate([a_ref[0], h_ref[0, 0]], axis=0)

    if fold:
        # Build the im2col patch tile in VMEM and do ONE deep MXU contraction
        # (K = KH*KW*Cin) instead of KH*KW shallow (rows,Cin)x(Cin,tn) dots.
        # TODO(synk): pad Wo up to a multiple of 8 for the 13/26/52-wide YOLO
        # layers so the per-tap reshape below stays relayout-free.
        for kh in range(KH):
            for kw in range(KW):
                t = kh * KW + kw
                patch_ref[:, t * Cin:(t + 1) * Cin] = (
                    win[kh:kh + th, kw:kw + Wo, :].reshape(rows, Cin))
        return jnp.dot(patch_ref[...], w_ref[...],
                       preferred_element_type=jnp.float32)

    # Tap-wise accumulation: contraction is already deep when Cin is large,
    # and this is the only path that supports stride > 1.
    acc = jnp.zeros((rows, w_ref.shape[-1]), jnp.float32)
    for kh in range(KH):
        for kw in range(KW):
            if stride == 1:
                slab = win[kh:kh + th, kw:kw + Wo, :]
            else:
                # TODO(synk): a space-to-batch phase split in the wrapper would
                # avoid these strided (XLU-routed) slices on stride-2 convs.
                slab = lax.slice(
                    win, (kh, kw, 0),
                    (kh + (th - 1) * stride + 1,
                     kw + (Wo - 1) * stride + 1, Cin),
                    (stride, stride, 1))
            acc = acc + jnp.dot(slab.reshape(rows, Cin),
                                w_ref[kh * KW + kw],
                                preferred_element_type=jnp.float32)
    return acc


def _conv_stats_kernel(a_ref, h_ref, w_ref, y_ref, ps_ref, pq_ref, patch_ref, *,
                       KH, KW, Cin, stride, th, Wo, fold):
    """Conv tile + per-block partial batch statistics; y written NCHW-flat."""
    acc = _conv_acc(a_ref, h_ref, w_ref, patch_ref, KH=KH, KW=KW, Cin=Cin,
                    stride=stride, th=th, Wo=Wo, fold=fold)
    ps_ref[...] = jnp.sum(acc, axis=0)[None, None, :]
    pq_ref[...] = jnp.sum(acc * acc, axis=0)[None, None, :]
    # In-kernel (rows, tn) -> (tn, rows) transpose: fuses the NHWC->NCHW
    # permute and makes the y store lane-dense even when Cout < 128.
    y_ref[0] = jnp.transpose(acc).astype(y_ref.dtype)


def _conv_bias_kernel(a_ref, h_ref, w_ref, b_ref, o_ref, patch_ref, *,
                      KH, KW, Cin, stride, th, Wo, fold):
    """Conv tile + bias (bn_act=False); output written NCHW-flat, single pass."""
    acc = _conv_acc(a_ref, h_ref, w_ref, patch_ref, KH=KH, KW=KW, Cin=Cin,
                    stride=stride, th=th, Wo=Wo, fold=fold)
    o_ref[0] = jnp.transpose(acc + b_ref[...]).astype(o_ref.dtype)


def _bn_leaky_kernel(y_ref, scale_ref, shift_ref, o_ref):
    """Folded BatchNorm (scale/shift) + LeakyReLU(0.1); pure NCHW streaming."""
    v = y_ref[...].astype(jnp.float32) * scale_ref[...] + shift_ref[...]
    o_ref[...] = jnp.where(v > 0.0, v, 0.1 * v)


# --------------------------------------------------------------------------
# Tile selection
# --------------------------------------------------------------------------
def _pick_th(Ho, Wo, Wp, Cin, tn, K, taps, stride, hcnt, fold, budget):
    """Output-row tile height: prefer the whole image; otherwise the largest
    divisor of Ho whose working set fits and whose row count is 128-aligned
    (so the lane-dense y block stays layout-legal)."""
    def need(th):
        rows = th * Wo
        b = 2 * _vmem_bytes((th * stride, Wp, Cin), 2)        # A block (dbl-buf)
        b += 2 * _vmem_bytes((hcnt, Wp, Cin), 2)              # halo block
        b += _vmem_bytes((th * stride + hcnt, Wp, Cin), 2)    # in-kernel window
        if fold:
            b += 2 * _vmem_bytes((K, tn), 2)                  # weights
            b += _vmem_bytes((rows, K), 2)                    # patch scratch
        else:
            b += 2 * taps * _vmem_bytes((Cin, tn), 2)
        b += 2 * _vmem_bytes((rows, Cin), 2)                  # per-tap slab temp
        b += _vmem_bytes((rows, tn), 4)                       # f32 accumulator
        b += _vmem_bytes((tn, rows), 4)                       # transposed tile
        b += 2 * _vmem_bytes((tn, rows), 2)                   # y block (dbl-buf)
        return b + (1 << 16)
    if need(Ho) <= budget:
        return Ho
    ok = [d for d in range(1, Ho) if Ho % d == 0
          and (d * Wo) % 128 == 0 and need(d) <= budget]
    if ok:
        return max(ok)
    return Ho   # full extent is always layout-legal; budget is advisory


def _pick_pass2_rows(NC, HoWo, budget):
    if NC % 8:
        return NC
    cand = [d for d in range(8, NC + 1, 8)
            if NC % d == 0 and d * _roundup(HoWo, 128) * 16 <= budget]
    if cand:
        return max(cand)
    return 8


# --------------------------------------------------------------------------
# Wrapper
# --------------------------------------------------------------------------
def cnn_block_forward(x, params, *, stride=1, padding=1, bn_act=True, eps=1e-5):
    w = params["conv_w"]                  # (Cout, Cin, KH, KW)  PyTorch OIHW
    Cout, Cin, KH, KW = w.shape
    N, C, H, W = x.shape
    assert C == Cin

    Ho = (H + 2 * padding - KH) // stride + 1
    Wo = (W + 2 * padding - KW) // stride + 1
    Hp, Wp = H + 2 * padding, W + 2 * padding
    HoWo = Ho * Wo
    taps = KH * KW
    K = taps * Cin
    hcnt = max(KH - stride, 1)            # halo rows per block (>=1 for uniformity)
    fold = (stride == 1 and Cin < 128)    # fold taps into one deep contraction

    cap = _vmem_capacity_bytes()          # per-generation (64 MiB v7x / 128 MiB v5e,v6e)
    vmem_limit = min(cap, 128 * 1024 * 1024) - 16 * 1024 * 1024
    budget = (vmem_limit * 3) // 5

    # Cout tiling: keep the full weight matrix resident (DMA'd once) unless huge.
    w_dbl = 2 * (_vmem_bytes((K, Cout), 2) if fold
                 else taps * _vmem_bytes((Cin, Cout), 2))
    if w_dbl <= max(budget // 4, 8 * 1024 * 1024) or (Cout % 128) != 0:
        tn = Cout
    else:
        tn = 256 if Cout % 256 == 0 else 128
    CB = Cout // tn

    th = _pick_th(Ho, Wo, Wp, Cin, tn, K, taps, stride, hcnt, fold, budget)
    HB = Ho // th
    rows = th * Wo

    # ---- glue: NCHW -> padded NHWC bf16 (extra bottom rows keep the halo
    #      gather in range for e.g. 1x1 kernels) ----
    pad_extra = max(0, Ho * stride + hcnt - Hp)
    xn = jnp.transpose(x, (0, 2, 3, 1)).astype(jnp.bfloat16)
    xp = jnp.pad(xn, ((0, 0), (padding, padding + pad_extra),
                      (padding, padding), (0, 0)))

    # ---- glue: tiny halo side-array (hcnt rows per block, ~(KH-1)/th of input;
    #      replaces the old full overlapping-row-block copy) ----
    starts = (jnp.arange(HB, dtype=jnp.int32) + 1) * (th * stride)
    rid = (starts[:, None] + jnp.arange(hcnt, dtype=jnp.int32)[None, :]).reshape(-1)
    xh = jnp.take(xp, rid, axis=1).reshape(N, HB, hcnt, Wp, Cin)

    # ---- weights (bf16 for the MXU) ----
    w_perm = jnp.transpose(w, (2, 3, 1, 0)).astype(jnp.bfloat16)   # (KH,KW,Cin,Cout)
    w_mat = w_perm.reshape(K, Cout) if fold else w_perm.reshape(taps, Cin, Cout)

    # ---- specs; c (Cout tile) is the OUTERMOST grid axis -> each weight tile
    #      is fetched exactly once even when CB > 1 ----
    grid = (CB, N, HB)
    a_spec = pl.BlockSpec((1, th * stride, Wp, Cin), lambda c, n, hb: (n, hb, 0, 0))
    h_spec = pl.BlockSpec((1, 1, hcnt, Wp, Cin), lambda c, n, hb: (n, hb, 0, 0, 0))
    if fold:
        w_spec = pl.BlockSpec((K, tn), lambda c, n, hb: (0, c))
    else:
        w_spec = pl.BlockSpec((taps, Cin, tn), lambda c, n, hb: (0, 0, c))
    y_spec = pl.BlockSpec((1, tn, rows), lambda c, n, hb: (n, c, hb))
    st_spec = pl.BlockSpec((1, 1, tn), lambda c, n, hb: (n * HB + hb, 0, c))

    patch_shape = (rows, K) if fold else (8, 128)       # dummy scratch when unused
    scratch = [pltpu.VMEM(patch_shape, jnp.bfloat16)]
    cparams = pltpu.CompilerParams(
        dimension_semantics=("parallel", "parallel", "parallel"),
        vmem_limit_bytes=vmem_limit)

    if not bn_act:
        bias = params["conv_b"].reshape(1, Cout).astype(jnp.float32)
        b_spec = pl.BlockSpec((1, tn), lambda c, n, hb: (0, c))
        kern = functools.partial(_conv_bias_kernel, KH=KH, KW=KW, Cin=Cin,
                                 stride=stride, th=th, Wo=Wo, fold=fold)
        out = pl.pallas_call(
            kern, grid=grid,
            in_specs=[a_spec, h_spec, w_spec, b_spec],
            out_specs=y_spec,
            out_shape=jax.ShapeDtypeStruct((N, Cout, HoWo), jnp.float32),
            scratch_shapes=scratch,
            compiler_params=cparams,
        )(xp, xh, w_mat, bias)
        return out.reshape(N, Cout, Ho, Wo)           # free reshape, no transpose

    # ---- pass 1: conv + per-block partial batch statistics; y is NCHW-flat bf16
    #      (deliberate bf16 intermediate: MXU/HBM bandwidth over last ~3 digits) ----
    kern = functools.partial(_conv_stats_kernel, KH=KH, KW=KW, Cin=Cin,
                             stride=stride, th=th, Wo=Wo, fold=fold)
    y, ps, pq = pl.pallas_call(
        kern, grid=grid,
        in_specs=[a_spec, h_spec, w_spec],
        out_specs=(y_spec, st_spec, st_spec),
        out_shape=(jax.ShapeDtypeStruct((N, Cout, HoWo), jnp.bfloat16),
                   jax.ShapeDtypeStruct((N * HB, 1, Cout), jnp.float32),
                   jax.ShapeDtypeStruct((N * HB, 1, Cout), jnp.float32)),
        scratch_shapes=scratch,
        compiler_params=cparams,
    )(xp, xh, w_mat)

    # ---- glue: fold training-mode BatchNorm into per-channel scale/shift ----
    Mtot = N * HoWo
    s1 = jnp.sum(ps[:, 0, :], axis=0)
    s2 = jnp.sum(pq[:, 0, :], axis=0)
    mean = s1 / Mtot
    # E[x^2]-mean^2 in f32 can cancel when |mean| >> std; the clamp guards rsqrt.
    # TODO(synk): a shifted / Welford-style reduction would be more robust.
    var = jnp.maximum(s2 / Mtot - mean * mean, 0.0)
    inv_std = lax.rsqrt(var + eps)
    gamma = params["bn_gamma"].astype(jnp.float32)
    beta = params["bn_beta"].astype(jnp.float32)
    scale = gamma * inv_std
    shift = beta - mean * scale
    # TODO(synk): running_mean/running_var momentum update (BatchNorm2d training
    # side effect, not part of the returned value) is omitted.

    # ---- pass 2: scale/shift + LeakyReLU, pure NCHW streaming (no transpose) ----
    NC = N * Cout
    y2 = y.reshape(NC, HoWo)                               # free reshape
    sc2 = jnp.broadcast_to(scale[None, :], (N, Cout)).reshape(NC, 1)
    sh2 = jnp.broadcast_to(shift[None, :], (N, Cout)).reshape(NC, 1)
    tr = _pick_pass2_rows(NC, HoWo, budget)
    out2 = pl.pallas_call(
        _bn_leaky_kernel, grid=(NC // tr,),
        in_specs=[pl.BlockSpec((tr, HoWo), lambda i: (i, 0)),
                  pl.BlockSpec((tr, 1), lambda i: (i, 0)),
                  pl.BlockSpec((tr, 1), lambda i: (i, 0))],
        out_specs=pl.BlockSpec((tr, HoWo), lambda i: (i, 0)),
        out_shape=jax.ShapeDtypeStruct((NC, HoWo), jnp.float32),
        compiler_params=pltpu.CompilerParams(
            dimension_semantics=("parallel",),
            vmem_limit_bytes=vmem_limit),
    )(y2, sc2, sh2)
    return out2.reshape(N, Cout, Ho, Wo)                   # free reshape


# --------------------------------------------------------------------------
# Deterministic parameter init (matches nn.Conv2d / nn.BatchNorm2d shapes)
# --------------------------------------------------------------------------
def init_params(key, in_channels, out_channels, kernel_size, bn_act=True):
    k1, k2, k3, k4 = jax.random.split(key, 4)
    fan_in = in_channels * kernel_size * kernel_size
    params = {
        "conv_w": jax.random.normal(
            k1, (out_channels, in_channels, kernel_size, kernel_size),
            jnp.float32) / np.sqrt(fan_in),
    }
    if bn_act:
        params["bn_gamma"] = 1.0 + 0.1 * jax.random.normal(
            k2, (out_channels,), jnp.float32)
        params["bn_beta"] = 0.1 * jax.random.normal(
            k3, (out_channels,), jnp.float32)
    else:
        params["conv_b"] = 0.1 * jax.random.normal(
            k4, (out_channels,), jnp.float32)
    return params


# --------------------------------------------------------------------------
# Pure-JAX reference (for correctness check)
# --------------------------------------------------------------------------
def reference_forward(x, params, *, stride=1, padding=1, bn_act=True, eps=1e-5):
    w = params["conv_w"]
    y = lax.conv_general_dilated(
        x.astype(jnp.float32), w.astype(jnp.float32),
        window_strides=(stride, stride),
        padding=[(padding, padding), (padding, padding)],
        dimension_numbers=("NCHW", "OIHW", "NCHW"))
    if not bn_act:
        return y + params["conv_b"][None, :, None, None]
    mean = jnp.mean(y, axis=(0, 2, 3), keepdims=True)
    var = jnp.mean((y - mean) ** 2, axis=(0, 2, 3), keepdims=True)
    yn = (y - mean) / jnp.sqrt(var + eps)
    yn = yn * params["bn_gamma"][None, :, None, None] \
            + params["bn_beta"][None, :, None, None]
    return jnp.where(yn > 0, yn, 0.1 * yn)


# --------------------------------------------------------------------------
if __name__ == "__main__":
    key = jax.random.PRNGKey(0)
    kx, kp, kp2 = jax.random.split(key, 3)

    # CNNBlock(4, 8, bn_act=True, kernel_size=3, stride=1, padding=1)
    x = jax.random.normal(kx, (2, 4, 16, 16), jnp.float32)

    params = init_params(kp, 4, 8, 3, bn_act=True)
    out = cnn_block_forward(x, params, stride=1, padding=1, bn_act=True)
    out = jax.block_until_ready(out)
    ref = reference_forward(x, params, stride=1, padding=1, bn_act=True)
    np.testing.assert_allclose(np.asarray(out), np.asarray(ref),
                               rtol=5e-2, atol=5e-2)

    # CNNBlock(4, 8, bn_act=False, kernel_size=3, stride=1, padding=1)
    params_nb = init_params(kp2, 4, 8, 3, bn_act=False)
    out_nb = cnn_block_forward(x, params_nb, stride=1, padding=1, bn_act=False)
    out_nb = jax.block_until_ready(out_nb)
    ref_nb = reference_forward(x, params_nb, stride=1, padding=1, bn_act=False)
    np.testing.assert_allclose(np.asarray(out_nb), np.asarray(ref_nb),
                               rtol=5e-2, atol=5e-2)

    print("KERNEL_OK")
</pallas_src>

<mosaic_0001>
module attributes {stable_mosaic.version = 11 : i64} {
  func.func @_conv_stats_kernel(%arg0: i32, %arg1: i32, %arg2: i32, %arg3: memref<1x16x18x4xbf16, #tpu.memory_space<vmem>>, %arg4: memref<1x1x2x18x4xbf16, #tpu.memory_space<vmem>>, %arg5: memref<36x8xbf16, #tpu.memory_space<vmem>>, %arg6: memref<1x8x256xbf16, #tpu.memory_space<vmem>>, %arg7: memref<1x1x8xf32, #tpu.memory_space<vmem>>, %arg8: memref<1x1x8xf32, #tpu.memory_space<vmem>>, %arg9: memref<256x36xbf16, #tpu.memory_space<vmem>>) attributes {dimension_semantics = [#tpu.dimension_semantics<parallel>, #tpu.dimension_semantics<parallel>, #tpu.dimension_semantics<parallel>], iteration_bounds = array<i64: 1, 2, 1>, scalar_prefetch = 0 : i64, scratch_operands = 1 : i64, tpu.core_type = #tpu.core_type<tc>, window_params = [{transform_indices = @transform_0, window_bounds = array<i64: 1, 16, 18, 4>}, {transform_indices = @transform_1, window_bounds = array<i64: 1, 1, 2, 18, 4>}, {transform_indices = @transform_2, window_bounds = array<i64: 36, 8>}, {transform_indices = @transform_3, window_bounds = array<i64: 1, 8, 256>}, {transform_indices = @transform_4, window_bounds = array<i64: 1, 1, 8>}, {transform_indices = @transform_5, window_bounds = array<i64: 1, 1, 8>}]} {
    %c0 = arith.constant 0 : index
    %c0_0 = arith.constant 0 : index
    %c0_1 = arith.constant 0 : index
    %c0_2 = arith.constant 0 : index
    %0 = vector.load %arg3[%c0, %c0_0, %c0_1, %c0_2] : memref<1x16x18x4xbf16, #tpu.memory_space<vmem>>, vector<1x16x18x4xbf16>
    %1 = vector.shape_cast %0 : vector<1x16x18x4xbf16> to vector<16x18x4xbf16>
    %c0_3 = arith.constant 0 : index
    %c0_4 = arith.constant 0 : index
    %c0_5 = arith.constant 0 : index
    %c0_6 = arith.constant 0 : index
    %c0_7 = arith.constant 0 : index
    %2 = vector.load %arg4[%c0_3, %c0_4, %c0_5, %c0_6, %c0_7] : memref<1x1x2x18x4xbf16, #tpu.memory_space<vmem>>, vector<1x1x2x18x4xbf16>
    %3 = vector.shape_cast %2 : vector<1x1x2x18x4xbf16> to vector<2x18x4xbf16>
    %4 = tpu.concatenate %1, %3 in 0 : vector<16x18x4xbf16>, vector<2x18x4xbf16> -> vector<18x18x4xbf16>
    %5 = vector.extract_strided_slice %4 {offsets = [0, 0, 0], sizes = [16, 16, 4], strides = [1, 1, 1]} : vector<18x18x4xbf16> to vector<16x16x4xbf16>
    %6 = vector.shape_cast %5 : vector<16x16x4xbf16> to vector<256x4xbf16>
    %c0_8 = arith.constant 0 : index
    %c0_9 = arith.constant 0 : index
    %7 = vector.load %arg9[%c0_8, %c0_9] : memref<256x36xbf16, #tpu.memory_space<vmem>>, vector<256x4xbf16>
    tpu.vector_store %arg9[%c0_8, %c0_9], %6 {strides = array<i32>} : memref<256x36xbf16, #tpu.memory_space<vmem>>, vector<256x4xbf16>,
    %8 = vector.extract_strided_slice %4 {offsets = [0, 1, 0], sizes = [16, 16, 4], strides = [1, 1, 1]} : vector<18x18x4xbf16> to vector<16x16x4xbf16>
    %9 = vector.shape_cast %8 : vector<16x16x4xbf16> to vector<256x4xbf16>
    %c0_10 = arith.constant 0 : index
    %c4 = arith.constant 4 : index
    %10 = vector.load %arg9[%c0_10, %c4] : memref<256x36xbf16, #tpu.memory_space<vmem>>, vector<256x4xbf16>
    tpu.vector_store %arg9[%c0_10, %c4], %9 {strides = array<i32>} : memref<256x36xbf16, #tpu.memory_space<vmem>>, vector<256x4xbf16>,
    %11 = vector.extract_strided_slice %4 {offsets = [0, 2, 0], sizes = [16, 16, 4], strides = [1, 1, 1]} : vector<18x18x4xbf16> to vector<16x16x4xbf16>
    %12 = vector.shape_cast %11 : vector<16x16x4xbf16> to vector<256x4xbf16>
    %c0_11 = arith.constant 0 : index
    %c8 = arith.constant 8 : index
    %13 = vector.load %arg9[%c0_11, %c8] : memref<256x36xbf16, #tpu.memory_space<vmem>>, vector<256x4xbf16>
    tpu.vector_store %arg9[%c0_11, %c8], %12 {strides = array<i32>} : memref<256x36xbf16, #tpu.memory_space<vmem>>, vector<256x4xbf16>,
    %14 = vector.extract_strided_slice %4 {offsets = [1, 0, 0], sizes = [16, 16, 4], strides = [1, 1, 1]} : vector<18x18x4xbf16> to vector<16x16x4xbf16>
    %15 = vector.shape_cast %14 : vector<16x16x4xbf16> to vector<256x4xbf16>
    %c0_12 = arith.constant 0 : index
    %c12 = arith.constant 12 : index
    %16 = vector.load %arg9[%c0_12, %c12] : memref<256x36xbf16, #tpu.memory_space<vmem>>, vector<256x4xbf16>
    tpu.vector_store %arg9[%c0_12, %c12], %15 {strides = array<i32>} : memref<256x36xbf16, #tpu.memory_space<vmem>>, vector<256x4xbf16>,
    %17 = vector.extract_strided_slice %4 {offsets = [1, 1, 0], sizes = [16, 16, 4], strides = [1, 1, 1]} : vector<18x18x4xbf16> to vector<16x16x4xbf16>
    %18 = vector.shape_cast %17 : vector<16x16x4xbf16> to vector<256x4xbf16>
    %c0_13 = arith.constant 0 : index
    %c16 = arith.constant 16 : index
    %19 = vector.load %arg9[%c0_13, %c16] : memref<256x36xbf16, #tpu.memory_space<vmem>>, vector<256x4xbf16>
    tpu.vector_store %arg9[%c0_13, %c16], %18 {strides = array<i32>} : memref<256x36xbf16, #tpu.memory_space<vmem>>, vector<256x4xbf16>,
    %20 = vector.extract_strided_slice %4 {offsets = [1, 2, 0], sizes = [16, 16, 4], strides = [1, 1, 1]} : vector<18x18x4xbf16> to vector<16x16x4xbf16>
    %21 = vector.shape_cast %20 : vector<16x16x4xbf16> to vector<256x4xbf16>
    %c0_14 = arith.constant 0 : index
    %c20 = arith.constant 20 : index
    %22 = vector.load %arg9[%c0_14, %c20] : memref<256x36xbf16, #tpu.memory_space<vmem>>, vector<256x4xbf16>
    tpu.vector_store %arg9[%c0_14, %c20], %21 {strides = array<i32>} : memref<256x36xbf16, #tpu.memory_space<vmem>>, vector<256x4xbf16>,
    %23 = vector.extract_strided_slice %4 {offsets = [2, 0, 0], sizes = [16, 16, 4], strides = [1, 1, 1]} : vector<18x18x4xbf16> to vector<16x16x4xbf16>
    %24 = vector.shape_cast %23 : vector<16x16x4xbf16> to vector<256x4xbf16>
    %c0_15 = arith.constant 0 : index
    %c24 = arith.constant 24 : index
    %25 = vector.load %arg9[%c0_15, %c24] : memref<256x36xbf16, #tpu.memory_space<vmem>>, vector<256x4xbf16>
    tpu.vector_store %arg9[%c0_15, %c24], %24 {strides = array<i32>} : memref<256x36xbf16, #tpu.memory_space<vmem>>, vector<256x4xbf16>,
    %26 = vector.extract_strided_slice %4 {offsets = [2, 1, 0], sizes = [16, 16, 4], strides = [1, 1, 1]} : vector<18x18x4xbf16> to vector<16x16x4xbf16>
    %27 = vector.shape_cast %26 : vector<16x16x4xbf16> to vector<256x4xbf16>
    %c0_16 = arith.constant 0 : index
    %c28 = arith.constant 28 : index
    %28 = vector.load %arg9[%c0_16, %c28] : memref<256x36xbf16, #tpu.memory_space<vmem>>, vector<256x4xbf16>
    tpu.vector_store %arg9[%c0_16, %c28], %27 {strides = array<i32>} : memref<256x36xbf16, #tpu.memory_space<vmem>>, vector<256x4xbf16>,
    %29 = vector.extract_strided_slice %4 {offsets = [2, 2, 0], sizes = [16, 16, 4], strides = [1, 1, 1]} : vector<18x18x4xbf16> to vector<16x16x4xbf16>
    %30 = vector.shape_cast %29 : vector<16x16x4xbf16> to vector<256x4xbf16>
    %c0_17 = arith.constant 0 : index
    %c32 = arith.constant 32 : index
    %31 = vector.load %arg9[%c0_17, %c32] : memref<256x36xbf16, #tpu.memory_space<vmem>>, vector<256x4xbf16>
    tpu.vector_store %arg9[%c0_17, %c32], %30 {strides = array<i32>} : memref<256x36xbf16, #tpu.memory_space<vmem>>, vector<256x4xbf16>,
    %c0_18 = arith.constant 0 : index
    %c0_19 = arith.constant 0 : index
    %32 = vector.load %arg9[%c0_18, %c0_19] : memref<256x36xbf16, #tpu.memory_space<vmem>>, vector<256x36xbf16>
    %c0_20 = arith.constant 0 : index
    %c0_21 = arith.constant 0 : index
    %33 = vector.load %arg5[%c0_20, %c0_21] : memref<36x8xbf16, #tpu.memory_space<vmem>>, vector<36x8xbf16>
    %cst = arith.constant dense<0.000000e+00> : vector<256x8xf32>
    %34 = tpu.matmul %32, %33, %cst {dimension_numbers = #tpu.dot_dimension_numbers<[1], [0], [0], [1], [0, 0, 1, 1], [], []>} : vector<256x36xbf16>, vector<36x8xbf16>, vector<256x8xf32> -> vector<256x8xf32>
    %cst_22 = arith.constant dense<0.000000e+00> : vector<8xf32>
    %35 = vector.multi_reduction <add>, %34, %cst_22 [0] : vector<256x8xf32> to vector<8xf32>
    %36 = vector.shape_cast %35 : vector<8xf32> to vector<1x1x8xf32>
    %c0_23 = arith.constant 0 : index
    %c0_24 = arith.constant 0 : index
    %c0_25 = arith.constant 0 : index
    %37 = vector.load %arg7[%c0_23, %c0_24, %c0_25] : memref<1x1x8xf32, #tpu.memory_space<vmem>>, vector<1x1x8xf32>
    tpu.vector_store %arg7[%c0_23, %c0_24, %c0_25], %36 {strides = array<i32>} : memref<1x1x8xf32, #tpu.memory_space<vmem>>, vector<1x1x8xf32>,
    %38 = arith.mulf %34, %34 : vector<256x8xf32>
    %cst_26 = arith.constant dense<0.000000e+00> : vector<8xf32>
    %39 = vector.multi_reduction <add>, %38, %cst_26 [0] : vector<256x8xf32> to vector<8xf32>
    %40 = vector.shape_cast %39 : vector<8xf32> to vector<1x1x8xf32>
    %c0_27 = arith.constant 0 : index
    %c0_28 = arith.constant 0 : index
    %c0_29 = arith.constant 0 : index
    %41 = vector.load %arg8[%c0_27, %c0_28, %c0_29] : memref<1x1x8xf32, #tpu.memory_space<vmem>>, vector<1x1x8xf32>
    tpu.vector_store %arg8[%c0_27, %c0_28, %c0_29], %40 {strides = array<i32>} : memref<1x1x8xf32, #tpu.memory_space<vmem>>, vector<1x1x8xf32>,
    %42 = tpu.transpose %34, [1, 0] : vector<256x8xf32> -> vector<8x256xf32>
    %43 = arith.truncf %42 : vector<8x256xf32> to vector<8x256xbf16>
    %c0_30 = arith.constant 0 : index
    %c0_31 = arith.constant 0 : index
    %c0_32 = arith.constant 0 : index
    %44 = vector.load %arg6[%c0_30, %c0_31, %c0_32] : memref<1x8x256xbf16, #tpu.memory_space<vmem>>, vector<1x8x256xbf16>
    %45 = vector.shape_cast %44 : vector<1x8x256xbf16> to vector<8x256xbf16>
    %46 = vector.shape_cast %43 : vector<8x256xbf16> to vector<1x8x256xbf16>
    tpu.vector_store %arg6[%c0_30, %c0_31, %c0_32], %46 {strides = array<i32>} : memref<1x8x256xbf16, #tpu.memory_space<vmem>>, vector<1x8x256xbf16>,
    return
  }
  func.func @transform_0(%arg0: i32, %arg1: i32, %arg2: i32) -> (i32, i32, i32, i32) {
    %c0_i32 = arith.constant 0 : i32
    %c0_i32_0 = arith.constant 0 : i32
    %c0_i32_1 = arith.constant 0 : i32
    return %arg1, %arg2, %c0_i32, %c0_i32_0 : i32, i32, i32, i32
  }
  func.func @transform_1(%arg0: i32, %arg1: i32, %arg2: i32) -> (i32, i32, i32, i32, i32) {
    %c0_i32 = arith.constant 0 : i32
    %c0_i32_0 = arith.constant 0 : i32
    %c0_i32_1 = arith.constant 0 : i32
    %c0_i32_2 = arith.constant 0 : i32
    return %arg1, %arg2, %c0_i32, %c0_i32_0, %c0_i32_1 : i32, i32, i32, i32, i32
  }
  func.func @transform_2(%arg0: i32, %arg1: i32, %arg2: i32) -> (i32, i32) {
    %c0_i32 = arith.constant 0 : i32
    %c0_i32_0 = arith.constant 0 : i32
    return %c0_i32, %arg0 : i32, i32
  }
  func.func @transform_3(%arg0: i32, %arg1: i32, %arg2: i32) -> (i32, i32, i32) {
    %c0_i32 = arith.constant 0 : i32
    return %arg1, %arg0, %arg2 : i32, i32, i32
  }
  func.func @transform_4(%arg0: i32, %arg1: i32, %arg2: i32) -> (i32, i32, i32) {
    %c1_i32 = arith.constant 1 : i32
    %0 = arith.muli %arg1, %c1_i32 : i32
    %1 = arith.addi %0, %arg2 : i32
    %c0_i32 = arith.constant 0 : i32
    %c0_i32_0 = arith.constant 0 : i32
    return %1, %c0_i32, %arg0 : i32, i32, i32
  }
  func.func @transform_5(%arg0: i32, %arg1: i32, %arg2: i32) -> (i32, i32, i32) {
    %c1_i32 = arith.constant 1 : i32
    %0 = arith.muli %arg1, %c1_i32 : i32
    %1 = arith.addi %0, %arg2 : i32
    %c0_i32 = arith.constant 0 : i32
    %c0_i32_0 = arith.constant 0 : i32
    return %1, %c0_i32, %arg0 : i32, i32, i32
  }
}

</mosaic_0001>

<bundles_post_ra>
// kernel: tpu_custom_call.1
= control target key start
LH: loop header
LB: loop body
LE: loop exit
PB: predicated region body
PF: predicated region fallthrough
CT: control target
= control target key end

     0   :  { %11 = vsyncpa [#allocation4], 0  ;;  %s4328_s0 = inlined_call_operand.vmem [shape: bf16[2,18,18,4], index: 0, kind: input, shape index: {}]   ;;  %s4329_s1 = inlined_call_operand.vmem [shape: bf16[2,1,2,18,4], index: 1, kind: input, shape index: {}]   ;;  %s4330_s2 = inlined_call_operand.vmem [shape: bf16[36,8], index: 2, kind: input, shape index: {}]   ;;  %s4331_s3 = inlined_call_operand.hbm [shape: bf16[2,8,256], index: 3, kind: output, shape index: {0}]   ;;  %s4332_s4 = inlined_call_operand.hbm [shape: f32[2,1,8], index: 4, kind: output, shape index: {1}]   ;;  %s4333_s5 = inlined_call_operand.hbm [shape: f32[2,1,8], index: 5, kind: output, shape index: {2}]  }
   0x1   :  { %13 = vsyncpa [#allocation4 + $0x1], 0 }
   0x2   :  { %14 = vsyncpa [#allocation6], 0 }
   0x3   :  { %16 = vsyncpa [#allocation6 + $0x1], 0  ;;  %s2974_s18 = smov 0   ;;  %s2976_s19 = smov 0  }
   0x4   :  { %s2978_s20 = smov 0   ;;  %s2980_s21 = smov 0  }
   0x5   :  { %s2982_s22 = smov 0   ;;  %s2984_s23 = smov 0  }
   0x6 LB: > { %s2487_s24 = sadd.s32 4294967295, %s2931_s23   ;;  %s4337_s25 = sadd.s32 4294967294, %s2931_s23   ;;  %s2931_s23 = sphi %s2984_s23, %s22_s23   ;;  %s2927_s22 = sphi %s2982_s22, %s4358_s22   ;;  %s2923_s21 = sphi %s2980_s21, %s4357_s21   ;;  %s2919_s20 = sphi %s2978_s20, %s4356_s20   ;;  %s2915_s19 = sphi %s2976_s19, %s4355_s19   ;;  %s2911_s18 = sphi %s2974_s18, %s4354_s18  }
   0x7   : > { %s37_s26 = sadd.s32 1, %s2927_s22  ;;  %s134_s27 = sadd.s32 1, %s2919_s20 }
   0x8   : > { %p39_p0 = scmp.ge.s32.totalorder %s37_s26, 2  ;;  %p144_p1 = scmp.ne.s32.totalorder %s2919_s20, %s2915_s19 }
   0x9   : > { %p145_p2 = scmp.eq.s32.totalorder %s2487_s24, 1  ;;  %p150_p3 = scmp.ne.s32.totalorder %s2915_s19, %s2911_s18 }
   0xa   : > { %s4360_s26 = smov (%p39_p0, %s37_s26), 0  ;;  %p151_p5 = scmp.eq.s32.totalorder %s4337_s25, 1 }
   0xb   : > { %p3016_p4 = por %p145_p2, %p144_p1  ;;  %s127_s29 = ssub.s32 %s2927_s22, %s4360_s26 }
   0xc   : > { %p2492_p6 = scmp.ge.s32.totalorder %s2931_s23, 1  ;;  %p132_p7 = scmp.eq.s32.totalorder %s127_s29, 0 }
   0xd   : > { %p3025_p8 = por %p151_p5, %p150_p3  ;;  %p272_p9 = scmp.lt.s32.totalorder %s2931_s23, 3 }
   0xe   : > { %s3031_s6 = scalar_select %p132_p7, %s2919_s20, %s134_s27  }
   0xf   : > { %p273_p10 = pnand %p2492_p6, %p272_p9 }
  0x11   : > { %276 = sbr.rel (%p273_p10) target bundleno = 731 (0x2db), region = 32 }
  0x18   : > { %p337_p11 = scmp.lt.s32.totalorder %s2923_s21, 1  ;;  %vm519_vm0 = vcmask 31744   ;;  %vm1052_vm1 = vcmask 1042432   ;;  %vm1053_vm2 = vcmask 1046532   ;;  %vm536_vm3 = vsmask.f32 3328 }
  0x19   : > { %vm537_vm4 = vsmask.f32 7440  ;;  %vm3061_vm5 = vmor %vm1052_vm1, %vm1053_vm2  ;;  %s2933_s12 = smov 12   ;;  %s2934_s13 = smov 20   ;;  %vm1841_vm7 = vcmask 1041408   ;;  %vm1019_vm8 = vcmask 64544  }
  0x1a   : > { %s3035_s7 = scalar_select %p337_p11, %s2923_s21, 1  ;;  %vm3098_vm6 = vmor %vm536_vm3, %vm537_vm4  ;;  %vm1263_vm9 = vcmask 97344   ;;  %vm1333_vm10 = vcmask 130144   ;;  %vm1425_vm11 = vcmask 162944   ;;  %vm1501_vm12 = vcmask 195744  }
  0x1b   : > { %s2935_s14 = smov 8   ;;  %s2936_s15 = smov 4   ;;  %vm1571_vm13 = vcmask 228544   ;;  %vm1663_vm14 = vcmask 261344   ;;  %vm1739_vm15 = vcmask 294144   ;;  %vm2006_vm1 = vcmask 64512  }
  0x1c   : > { %s2662_s8 = smul.u32 216, %s3035_s7  ;;  %s2937_s27 = smov 16   ;;  %vm2076_vm2 = vcmask 57344  }
  0x1d   : > { %s2938_s9 = smov 24   ;;  %s2939_s10 = smov 28  }
  0x1e   : > { %s3041_s11 = scalar_lea.vmem %s4328_s0, %s2662_s8  ;;  %s2940_s16 = smov 32  }
  0x1f   : > { %v3044_v0 = vld [vmem:[%s3041_s11 + $0x18] sm:$0xf]  ;;  %v3047_v1 = vld [vmem:[%s3041_s11 + $0x1c] sm:$0xf]  ;;  %v372_v2 = vld [vmem:[%s3041_s11 + $0xc] sm:$0xf] }
  0x20   : > { %v3052_v3 = vcombine.low %v3044_v0, %v3047_v1  ;;  %v588_v4 = vshrl.u32 %v3044_v0, 16  ;;  %v591_v5 = vshll.u32 %v3044_v0, 16  ;;  %v601_v6 = vshrl.u32 %v3047_v1, 16  ;;  %v373_v7 = vld [vmem:[%s3041_s11 + $0x10] sm:$0xf] }
  0x21   : > { %v2497_v8 = vcombine.low %v372_v2, %v373_v7  ;;  %v564_v9 = vshrl.u32 %v372_v2, 16  ;;  %v567_v10 = vshll.u32 %v372_v2, 16  ;;  %v573_v11 = vshll.u32 %v373_v7, 16  ;;  %v374_v12 = vld [vmem:[%s3041_s11 + $0x14] sm:$0x1] }
  0x22   : > { %1287 = vrot.lane.b32.xlu1 %v3052_v3, %s2933_s12  ;;  %v577_v14 = vshrl.u32 %v373_v7, 16  ;;  %522 = vst.msk [vmem:[#allocation2 + $0x10] sm:$0xff] %vm519_vm0, %v3052_v3  ;;  %v2529_v15 = vrot.slane %v372_v2, 9  ;;  %v1064_v16 = vrot.slane %v373_v7, 5  ;;  %v1067_v17 = vrot.slane %v374_v12, 5 }
  0x23   : > { %v3070_v18 = vld [vmem:[%s3041_s11] sm:$0xf]  ;;  %v566_v19 = vrot.slane %v564_v9, 4  ;;  %v569_v20 = vrot.slane %v567_v10, 5  ;;  %1285 = vrot.lane.b32.xlu0 %v2497_v8, %s2933_s12  ;;  %521 = vst.msk [vmem:[#allocation2 + $0x8] sm:$0xff] %vm519_vm0, %v2497_v8  ;;  %v2530_v45 = vrot.slane %v3044_v0, 9 }
  0x24   : > { %v3075_v21 = vld [vmem:[%s3041_s11 + $0x4] sm:$0xf]  ;;  %v371_v22 = vld [vmem:[%s3041_s11 + $0x8] sm:$0x1]  ;;  %v579_v23 = vrot.slane %v577_v14, 4  ;;  %v1065_v24 = vsel %vm3061_vm5, %v2529_v15, %v1064_v16  ;;  %v1066_v25 = vrot.slane %v1064_v16, 4 }
  0x25   : > { %v2528_v26 = vrot.slane %v3070_v18, 9  ;;  %v1057_v27 = vrot.slane %v3075_v21, 5  ;;  %v1060_v28 = vrot.slane %v371_v22, 5  ;;  %v540_v29 = vshrl.u32 %v3070_v18, 16  ;;  %v377_v35 = vld [vmem:[%s3041_s11 + $0x20] sm:$0x1] }
  0x26   : > { %v543_v30 = vshll.u32 %v3070_v18, 16  ;;  %v1068_v31 = vsel %vm3061_vm5, %v1066_v25, %v1067_v17  ;;  %v549_v32 = vshll.u32 %v3075_v21, 16  ;;  %v553_v33 = vshrl.u32 %v3075_v21, 16  ;;  %v3112_v7 = vld [vmem:[%s3041_s11 + $0x24] sm:$0xf] }
  0x27   : > { %v559_v34 = vshll.u32 %v371_v22, 16  ;;  %v2545_v36 = vcombine.low %v1065_v24, %v1068_v31  ;;  %v1058_v37 = vsel %vm3061_vm5, %v2528_v26, %v1057_v27  ;;  %v1059_v38 = vrot.slane %v1057_v27, 4  ;;  %v3139_v24 = vld [vmem:[%s3041_s11 + $0x2c] sm:$0x1]  ;;  %v3145_v27 = vld [vmem:[%s3041_s11 + $0x30] sm:$0xf] }
  0x28   : > { %v542_v39 = vrot.slane %v540_v29, 4  ;;  %v545_v40 = vrot.slane %v543_v30, 5  ;;  %v551_v41 = vrot.slane %v549_v32, 5  ;;  %v555_v42 = vrot.slane %v553_v33, 4  ;;  %v3149_v32 = vld [vmem:[%s3041_s11 + $0x34] sm:$0xf] }
  0x29   : > { %v561_v43 = vrot.slane %v559_v34, 5  ;;  %1453 = vrot.lane.b32.xlu0 %v2545_v36, %s2934_s13  ;;  %v1061_v44 = vsel %vm3061_vm5, %v1059_v38, %v1060_v28  ;;  %v1071_v46 = vrot.slane %v3047_v1, 5  ;;  %v1074_v47 = vrot.slane %v377_v35, 5 }
  0x2a   : > { %v2544_v48 = vcombine.low %v1058_v37, %v1061_v44  ;;  %v546_v49 = vor.u32 %v545_v40, %v542_v39  ;;  %v556_v50 = vor.u32 %v555_v42, %v551_v41  ;;  %v570_v51 = vor.u32 %v569_v20, %v566_v19  ;;  %v3162_v40 = vld [vmem:[%s3041_s11 + $0x60] sm:$0xf] }
  0x2b   : > { %v1072_v53 = vsel %vm3061_vm5, %v2530_v45, %v1071_v46  ;;  %v1073_v54 = vrot.slane %v1071_v46, 4  ;;  %v575_v55 = vrot.slane %v573_v11, 5  ;;  %v583_v56 = vshll.u32 %v374_v12, 16  ;;  %v3167_v45 = vld [vmem:[%s3041_s11 + $0x64] sm:$0xf] }
  0x2c   : > { %1215 = vrot.lane.b32.xlu1 %v2544_v48, %s2935_s14  ;;  %v547_v57 = vrot.slane %v546_v49, 4  ;;  %v557_v58 = vrot.slane %v556_v50, 4  ;;  %v571_v59 = vrot.slane %v570_v51, 4  ;;  %v590_v60 = vrot.slane %v588_v4, 4 }
  0x2d   : > { %v1075_v61 = vsel %vm3061_vm5, %v1073_v54, %v1074_v47  ;;  %v580_v62 = vor.u32 %v579_v23, %v575_v55  ;;  %v585_v63 = vrot.slane %v583_v56, 5  ;;  %v593_v2 = vrot.slane %v591_v5, 5  ;;  %v3124_v5 = vld [vmem:[%s3041_s11 + $0x28] sm:$0xf]  ;;  %v2785_v47 = vld [vmem:[%s4330_s2] sm:$0xff]  }
  0x2e   : > { %v552_v8 = vsel %vm3098_vm6, %v547_v57, %v551_v41  ;;  %v562_v9 = vsel %vm3098_vm6, %v557_v58, %v561_v43  ;;  %v3118_v10 = vcombine.low %v1072_v53, %v1075_v61  ;;  %v576_v4 = vsel %vm3098_vm6, %v571_v59, %v575_v55  ;;  %2616 = vmatprep.subr.bf16.mxu0 %v2785_v47  ;;  %v2786_v59 = vld [vmem:[%s4330_s2 + $0x8] sm:$0xff]  }
  0x2f   : > { %v2512_v11 = vcombine.low %v552_v8, %v562_v9  ;;  %v581_v12 = vrot.slane %v580_v62, 4  ;;  %v594_v14 = vor.u32 %v593_v2, %v590_v60  ;;  %v597_v0 = vshll.u32 %v3047_v1, 16  ;;  %2617 = vmatpush3.bf16.msra.mxu0 %v2785_v47  ;;  %2654 = vmatprep.subr.bf16.mxu1 %v2785_v47 }
  0x30   : > { %1217 = vrot.lane.b32.xlu1 %v2545_v36, %s2935_s14  ;;  %v603_v15 = vrot.slane %v601_v6, 4  ;;  %v607_v16 = vshll.u32 %v377_v35, 16  ;;  %v3131_v17 = vcombine.low %v3112_v7, %v3124_v5  ;;  %v612_v19 = vshrl.u32 %v3112_v7, 16  ;;  %2657 = vmatpush3.bf16.msra.mxu1 %v2785_v47  ;;  %v3253_v47 = vld [vmem:[%s3041_s11 + $0x78] sm:$0xf] }
  0x31   : > { %971 = vrot.lane.b32.xlu0 %v2512_v11, %s2936_s15  ;;  %v586_v20 = vsel %vm3098_vm6, %v581_v12, %v585_v63  ;;  %v595_v22 = vrot.slane %v594_v14, 4  ;;  %v599_v23 = vrot.slane %v597_v0, 5  ;;  %v615_v1 = vshll.u32 %v3112_v7, 16  ;;  %2618 = vmatprep.subr.bf16.mxu0 %v2786_v59 }
  0x32   : > { %v2513_v6 = vcombine.low %v576_v4, %v586_v20  ;;  %v625_v25 = vshrl.u32 %v3124_v5, 16  ;;  %523 = vst.msk [vmem:[#allocation2 + $0x18] sm:$0xff] %vm519_vm0, %v3131_v17  ;;  %v614_v26 = vrot.slane %v612_v19, 4  ;;  %v609_v29 = vrot.slane %v607_v16, 5  ;;  %2655 = vmatprep.subr.bf16.mxu1 %v2786_v59 }
  0x33   : > { %v604_v28 = vor.u32 %v603_v15, %v599_v23  ;;  %v617_v30 = vrot.slane %v615_v1, 5  ;;  %v621_v31 = vshll.u32 %v3124_v5, 16  ;;  %v631_v34 = vshll.u32 %v3139_v24, 16  ;;  %2619 = vmatpush3.bf16.msra.mxu0 %v2786_v59 }
  0x34   : > { %1455 = vrot.lane.b32.xlu1 %v3118_v10, %s2934_s13  ;;  %v627_v33 = vrot.slane %v625_v25, 4  ;;  %v600_v35 = vsel %vm3098_vm6, %v595_v22, %v599_v23  ;;  %v3159_v39 = vcombine.low %v3145_v27, %v3149_v32  ;;  %v1078_v49 = vrot.slane %v3124_v5, 5  ;;  %2658 = vmatpush3.bf16.msra.mxu1 %v2786_v59  ;;  %v3211_v5 = vld [vmem:[%s3041_s11 + $0x6c] sm:$0xf]  ;;  %v3219_v22 = vld [vmem:[%s3041_s11 + $0x70] sm:$0xf] }
  0x35   : > { %973 = vrot.lane.b32.xlu0 %v2513_v6, %s2936_s15  ;;  %v605_v36 = vrot.slane %v604_v28, 4  ;;  %v618_v37 = vor.u32 %v617_v30, %v614_v26  ;;  %v623_v38 = vrot.slane %v621_v31, 5  ;;  %v633_v44 = vrot.slane %v631_v34, 5  ;;  %v3222_v23 = vld [vmem:[%s3041_s11 + $0x38] sm:$0x1] }
  0x36   : > { %524 = vst.msk [vmem:[#allocation2 + $0x20] sm:$0xff] %vm519_vm0, %v3159_v39  ;;  %v732_v50 = vshrl.u32 %v3162_v40, 16  ;;  %v735_v51 = vshll.u32 %v3162_v40, 16  ;;  %v741_v53 = vshll.u32 %v3167_v45, 16  ;;  %v745_v54 = vshrl.u32 %v3167_v45, 16 }
  0x37   : > { %v610_v41 = vsel %vm3098_vm6, %v605_v36, %v609_v29  ;;  %v619_v42 = vrot.slane %v618_v37, 4  ;;  %v628_v43 = vor.u32 %v627_v33, %v623_v38  ;;  %v636_v57 = vshrl.u32 %v3145_v27, 16  ;;  %v3236_v33 = vld [vmem:[%s3041_s11 + $0x3c] sm:$0xf]  ;;  %v3276_v59 = vld [vmem:[%s3041_s11 + $0x74] sm:$0x1] }
  0x38   : > { %v3169_v46 = vcombine.low %v600_v35, %v610_v41  ;;  %v639_v58 = vshll.u32 %v3145_v27, 16  ;;  %v2531_v60 = vrot.slane %v3112_v7, 9  ;;  %v1080_v61 = vrot.slane %v1078_v49, 4  ;;  %v395_v7 = vld [vmem:[%s3041_s11 + $0x68] sm:$0x1] }
  0x39   : > { %1377 = vrot.lane.b32.xlu0 %v2513_v6, %s2937_s27  ;;  %v629_v48 = vrot.slane %v628_v43, 4  ;;  %v624_v55 = vsel %vm3098_vm6, %v619_v42, %v623_v38  ;;  %v1081_v62 = vrot.slane %v3139_v24, 5  ;;  %v734_v63 = vrot.slane %v732_v50, 4  ;;  %v3242_v38 = vld [vmem:[%s3041_s11 + $0x40] sm:$0xf] }
  0x3a   : > { %1379 = vrot.lane.b32.xlu1 %v3169_v46, %s2937_s27  ;;  %v737_v8 = vrot.slane %v735_v51, 5  ;;  %v3201_v9 = vrot.slane %v741_v53, 5  ;;  %v747_v4 = vrot.slane %v745_v54, 4  ;;  %v638_v11 = vrot.slane %v636_v57, 4  ;;  %v3256_v51 = vld [vmem:[%s3041_s11 + $0x7c] sm:$0xf] }
  0x3b   : > { %v634_v56 = vsel %vm3098_vm6, %v629_v48, %v633_v44  ;;  %v641_v12 = vrot.slane %v639_v58, 5  ;;  %v645_v14 = vshll.u32 %v3149_v32, 16  ;;  %v1079_v0 = vsel %vm3061_vm5, %v2531_v60, %v1078_v49 }
  0x3c   : > { %v3199_v2 = vcombine.low %v624_v55, %v634_v56  ;;  %v1082_v15 = vsel %vm3061_vm5, %v1080_v61, %v1081_v62  ;;  %v738_v16 = vor.u32 %v737_v8, %v734_v63  ;;  %v748_v19 = vor.u32 %v747_v4, %v3201_v9 }
  0x3d   : > { %1523 = vrot.lane.b32.xlu0 %v3052_v3, %s2938_s9  ;;  %v649_v3 = vshrl.u32 %v3149_v32, 16  ;;  %v751_v20 = vshll.u32 %v395_v7, 16  ;;  %v642_v1 = vor.u32 %v641_v12, %v638_v11  ;;  %v3224_v24 = vrot.slane %v645_v14, 5 }
  0x3e   : > { %1525 = vrot.lane.b32.xlu1 %v3131_v17, %s2938_s9  ;;  %v1113_v25 = vrot.slane %v3167_v45, 5  ;;  %v756_v26 = vshrl.u32 %v3211_v5, 16  ;;  %v759_v28 = vshll.u32 %v3211_v5, 16  ;;  %v3231_v29 = vcombine.low %v1079_v0, %v1082_v15 }
  0x3f   : > { %v651_v6 = vrot.slane %v649_v3, 4  ;;  %v765_v30 = vshll.u32 %v3219_v22, 16  ;;  %v769_v31 = vshrl.u32 %v3219_v22, 16  ;;  %v739_v34 = vrot.slane %v738_v16, 4 }
  0x40   : > { %v749_v35 = vrot.slane %v748_v19, 4  ;;  %v753_v36 = vrot.slane %v751_v20, 5  ;;  %v655_v37 = vshll.u32 %v3222_v23, 16  ;;  %v3244_v41 = vrot.slane %v642_v1, 4 }
  0x41   : > { %1615 = vrot.lane.b32.xlu0 %v3169_v46, %s2939_s10  ;;  %v652_v42 = vor.u32 %v651_v6, %v3224_v24  ;;  %v2536_v43 = vrot.slane %v3162_v40, 9  ;;  %v3250_v44 = vcombine.low %v3211_v5, %v3219_v22  ;;  %v1116_v48 = vrot.slane %v395_v7, 5 }
  0x42   : > { %1617 = vrot.lane.b32.xlu1 %v3199_v2, %s2939_s10  ;;  %v758_v49 = vrot.slane %v756_v26, 4  ;;  %v761_v50 = vrot.slane %v759_v28, 5  ;;  %v3260_v53 = vrot.slane %v765_v30, 5  ;;  %v771_v54 = vrot.slane %v769_v31, 4  ;;  %v3320_v31 = vld [vmem:[%s3041_s11 + $0x80] sm:$0x1] }
  0x43   : > { %529 = vst.msk [vmem:[#allocation2 + $0x48] sm:$0xff] %vm519_vm0, %v3250_v44  ;;  %v3266_v55 = vcombine.low %v3236_v33, %v3242_v38  ;;  %v744_v56 = vsel %vm3098_vm6, %v739_v34, %v3201_v9  ;;  %v754_v57 = vsel %vm3098_vm6, %v749_v35, %v753_v36  ;;  %v657_v58 = vrot.slane %v655_v37, 5  ;;  %v3327_v37 = vld [vmem:[%s3041_s11 + $0x84] sm:$0xf] }
  0x44   : > { %v648_v60 = vsel %vm3098_vm6, %v3244_v41, %v3224_v24  ;;  %v653_v61 = vrot.slane %v652_v42, 4  ;;  %v1114_v62 = vsel %vm3061_vm5, %v2536_v43, %v1113_v25  ;;  %v3288_v63 = vcombine.low %v3253_v47, %v3256_v51  ;;  %v3315_v24 = vld [vmem:[%s3041_s11 + $0x44] sm:$0x1] }
  0x45   : > { %1691 = vrot.lane.b32.xlu0 %v3118_v10, %s2940_s16  ;;  %525 = vst.msk [vmem:[#allocation2 + $0x28] sm:$0xff] %vm519_vm0, %v3266_v55  ;;  %v762_v9 = vor.u32 %v761_v50, %v758_v49  ;;  %v660_v4 = vshrl.u32 %v3236_v33, 16  ;;  %v663_v3 = vshll.u32 %v3236_v33, 16  ;;  %v3296_v7 = vcombine.low %v744_v56, %v754_v57 }
  0x46   : > { %975 = vrot.lane.b32.xlu1 %v3169_v46, %s2936_s15  ;;  %v1115_v46 = vrot.slane %v1113_v25, 4  ;;  %v772_v11 = vor.u32 %v771_v54, %v3260_v53  ;;  %v775_v12 = vshll.u32 %v3276_v59, 16  ;;  %v673_v14 = vshrl.u32 %v3242_v38, 16  ;;  %530 = vst.msk [vmem:[#allocation2 + $0x50] sm:$0xff] %vm519_vm0, %v3288_v63 }
  0x47   : > { %v780_v0 = vshrl.u32 %v3253_v47, 16  ;;  %v783_v15 = vshll.u32 %v3253_v47, 16  ;;  %v669_v16 = vshll.u32 %v3242_v38, 16  ;;  %v658_v19 = vsel %vm3098_vm6, %v653_v61, %v657_v58 }
  0x48   : > { %v1117_v8 = vsel %vm3061_vm5, %v1115_v46, %v1116_v48  ;;  %v1085_v1 = vrot.slane %v3149_v32, 5  ;;  %v789_v6 = vshll.u32 %v3256_v51, 16  ;;  %v763_v25 = vrot.slane %v762_v9, 4  ;;  %v3334_v46 = vld [vmem:[%s3041_s11 + $0x88] sm:$0xf] }
  0x49   : > { %1693 = vrot.lane.b32.xlu0 %v3231_v29, %s2940_s16  ;;  %v3311_v20 = vcombine.low %v1114_v62, %v1117_v8  ;;  %v2532_v26 = vrot.slane %v3145_v27, 9  ;;  %v662_v28 = vrot.slane %v660_v4, 4  ;;  %v665_v30 = vrot.slane %v663_v3, 5  ;;  %v3362_v9 = vld [vmem:[%s3041_s11 + $0x48] sm:$0xf] }
  0x4a   : > { %977 = vrot.lane.b32.xlu1 %v3199_v2, %s2936_s15  ;;  %v773_v34 = vrot.slane %v772_v11, 4  ;;  %v777_v35 = vrot.slane %v775_v12, 5  ;;  %v3324_v36 = vrot.slane %v669_v16, 5  ;;  %v675_v32 = vrot.slane %v673_v14, 4  ;;  %v3365_v4 = vld [vmem:[%s3041_s11 + $0x4c] sm:$0xf] }
  0x4b   : > { %v782_v41 = vrot.slane %v780_v0, 4  ;;  %v785_v42 = vrot.slane %v783_v15, 5  ;;  %v3331_v27 = vrot.slane %v789_v6, 5  ;;  %v3336_v48 = vcombine.low %v648_v60, %v658_v19 }
  0x4c   : > { %v1088_v49 = vrot.slane %v3222_v23, 5  ;;  %v1120_v50 = vrot.slane %v3219_v22, 5  ;;  %v768_v54 = vsel %vm3098_vm6, %v763_v25, %v3260_v53  ;;  %v1086_v56 = vsel %vm3061_vm5, %v2532_v26, %v1085_v1 }
  0x4d   : > { %1219 = vrot.lane.b32.xlu0 %v3118_v10, %s2935_s14  ;;  %v793_v10 = vshrl.u32 %v3256_v51, 16  ;;  %v666_v57 = vor.u32 %v665_v30, %v662_v28  ;;  %v679_v58 = vshll.u32 %v3315_v24, 16  ;;  %v778_v23 = vsel %vm3098_vm6, %v773_v34, %v777_v35 }
  0x4e   : > { %1221 = vrot.lane.b32.xlu1 %v3231_v29, %s2935_s14  ;;  %v676_v60 = vor.u32 %v675_v32, %v3324_v36  ;;  %v799_v22 = vshll.u32 %v3320_v31, 16  ;;  %v3354_v61 = vcombine.low %v3327_v37, %v3334_v46  ;;  %v2537_v53 = vrot.slane %v3211_v5, 9 }
  0x4f   : > { %v795_v43 = vrot.slane %v793_v10, 4  ;;  %v786_v62 = vor.u32 %v785_v42, %v782_v41  ;;  %v1122_v11 = vrot.slane %v1120_v50, 4  ;;  %v1123_v12 = vrot.slane %v3276_v59, 5 }
  0x50   : > { %v1127_v14 = vrot.slane %v3256_v51, 5  ;;  %531 = vst.msk [vmem:[#allocation2 + $0x58] sm:$0xff] %vm519_vm0, %v3354_v61  ;;  %v3373_v5 = vcombine.low %v768_v54, %v778_v23  ;;  %v667_v0 = vrot.slane %v666_v57, 4  ;;  %v681_v15 = vrot.slane %v679_v58, 5  ;;  %v3426_v54 = vld [vmem:[%s3041_s11 + $0x50] sm:$0x1] }
  0x51   : > { %1289 = vrot.lane.b32.xlu0 %v3131_v17, %s2933_s12  ;;  %v1087_v17 = vrot.slane %v1085_v1, 4  ;;  %v796_v8 = vor.u32 %v795_v43, %v3331_v27  ;;  %v677_v10 = vrot.slane %v676_v60, 4  ;;  %v801_v16 = vrot.slane %v799_v22, 5  ;;  %v3437_v60 = vld [vmem:[%s3041_s11 + $0x54] sm:$0xf] }
  0x52   : > { %1291 = vrot.lane.b32.xlu1 %v3159_v39, %s2933_s12  ;;  %v1095_v19 = vrot.slane %v3315_v24, 5  ;;  %v3381_v59 = vcombine.low %v3362_v9, %v3365_v4  ;;  %v787_v51 = vrot.slane %v786_v62, 4  ;;  %v2538_v25 = vrot.slane %v3253_v47, 9  ;;  %v3440_v22 = vld [vmem:[%s3041_s11 + $0x58] sm:$0xf] }
  0x53   : > { %v1089_v3 = vsel %vm3061_vm5, %v1087_v17, %v1088_v49  ;;  %v797_v1 = vrot.slane %v796_v8, 4  ;;  %v1130_v26 = vrot.slane %v3320_v31, 5  ;;  %v1121_v24 = vsel %vm3061_vm5, %v2537_v53, %v1120_v50 }
  0x54   : > { %526 = vst.msk [vmem:[#allocation2 + $0x30] sm:$0xff] %vm519_vm0, %v3381_v59  ;;  %v3389_v28 = vcombine.low %v1086_v56, %v1089_v3  ;;  %v672_v47 = vsel %vm3098_vm6, %v667_v0, %v3324_v36  ;;  %v682_v30 = vsel %vm3098_vm6, %v677_v10, %v681_v15  ;;  %v792_v34 = vsel %vm3098_vm6, %v787_v51, %v3331_v27  ;;  %v3450_v3 = vld [vmem:[%s3041_s11 + $0x8c] sm:$0x1]  ;;  %v3468_v10 = vld [vmem:[%s3041_s11 + $0x90] sm:$0xf] }
  0x55   : > { %1381 = vrot.lane.b32.xlu0 %v3199_v2, %s2937_s27  ;;  %v1092_v2 = vrot.slane %v3242_v38, 5  ;;  %v2533_v38 = vrot.slane %v3236_v33, 9  ;;  %v1129_v33 = vrot.slane %v1127_v14, 4  ;;  %v802_v35 = vsel %vm3098_vm6, %v797_v1, %v801_v16  ;;  %v3471_v16 = vld [vmem:[%s3041_s11 + $0x94] sm:$0xf] }
  0x56   : > { %987 = vrot.lane.b32.xlu1 %v3296_v7, %s2936_s15  ;;  %v1128_v32 = vsel %vm3061_vm5, %v2538_v25, %v1127_v14  ;;  %v804_v42 = vshrl.u32 %v3327_v37, 16  ;;  %v807_v43 = vshll.u32 %v3327_v37, 16  ;;  %v2534_v27 = vrot.slane %v3362_v9, 9 }
  0x57   : > { %v1094_v6 = vrot.slane %v1092_v2, 4  ;;  %v1093_v31 = vsel %vm3061_vm5, %v2533_v38, %v1092_v2  ;;  %v1131_v41 = vsel %vm3061_vm5, %v1129_v33, %v1130_v26  ;;  %v3422_v49 = vcombine.low %v672_v47, %v682_v30  ;;  %v392_v26 = vld [vmem:[%s3041_s11 + $0x5c] sm:$0x1] }
  0x58   : > { %v817_v50 = vshrl.u32 %v3334_v46, 16  ;;  %v3430_v56 = vcombine.low %v792_v34, %v802_v35  ;;  %v1099_v58 = vrot.slane %v3365_v4, 5  ;;  %v1102_v23 = vrot.slane %v3426_v54, 5 }
  0x59   : > { %1383 = vrot.lane.b32.xlu0 %v3336_v48, %s2937_s27  ;;  %v1096_v36 = vsel %vm3061_vm5, %v1094_v6, %v1095_v19  ;;  %v3444_v53 = vcombine.low %v1128_v32, %v1131_v41  ;;  %v684_v62 = vshrl.u32 %v3362_v9, 16  ;;  %v687_v8 = vshll.u32 %v3362_v9, 16  ;;  %v3505_v32 = vld [vmem:[%s3041_s11 + $0x98] sm:$0x1]  ;;  %v414_v19 = vld [vmem:[%s3041_s11 + $0xb4] sm:$0xf] }
  0x5a   : > { %1457 = vrot.lane.b32.xlu1 %v3231_v29, %s2934_s13  ;;  %v1124_v29 = vsel %vm3061_vm5, %v1122_v11, %v1123_v12  ;;  %v3432_v57 = vcombine.low %v1093_v31, %v1096_v36  ;;  %v697_v2 = vshrl.u32 %v3365_v4, 16  ;;  %v3452_v11 = vrot.slane %v804_v42, 4 }
  0x5b   : > { %v3420_v17 = vcombine.low %v1121_v24, %v1124_v29  ;;  %v3454_v12 = vrot.slane %v807_v43, 5  ;;  %v1100_v14 = vsel %vm3061_vm5, %v2534_v27, %v1099_v58  ;;  %v1101_v0 = vrot.slane %v1099_v58, 4 }
  0x5c   : > { %v3459_v15 = vrot.slane %v817_v50, 4  ;;  %v2496_v38 = vcombine.low %v3070_v18, %v3075_v21  ;;  %v3465_v9 = vcombine.low %v3437_v60, %v3440_v22  ;;  %v708_v1 = vshrl.u32 %v3437_v60, 16 }
  0x5d   : > { %989 = vrot.lane.b32.xlu0 %v3373_v5, %s2936_s15  ;;  %4345 = vst [vmem:[#allocation10_spill] sm:$0xff] %v3420_v17  ;;  %v1103_v51 = vsel %vm3061_vm5, %v1101_v0, %v1102_v23  ;;  %v711_v18 = vshll.u32 %v3437_v60, 16  ;;  %v3482_v21 = vrot.slane %v684_v62, 4  ;;  %v3484_v6 = vrot.slane %v687_v8, 5 }
  0x5e   : > { %1231 = vrot.lane.b32.xlu1 %v3311_v20, %s2935_s14  ;;  %v3486_v25 = vcombine.low %v1100_v14, %v1103_v51  ;;  %520 = vst.msk [vmem:[#allocation2] sm:$0xff] %vm519_vm0, %v2496_v38  ;;  %v721_v33 = vshrl.u32 %v3440_v22, 16  ;;  %527 = vst.msk [vmem:[#allocation2 + $0x38] sm:$0xff] %vm519_vm0, %v3465_v9  ;;  %v3495_v24 = vcombine.low %v3468_v10, %v3471_v16  ;;  %v828_v29 = vshrl.u32 %v3468_v10, 16 }
  0x5f   : > { %v831_v47 = vshll.u32 %v3468_v10, 16  ;;  %v841_v30 = vshrl.u32 %v3471_v16, 16  ;;  %v710_v35 = vrot.slane %v708_v1, 4  ;;  %v713_v36 = vrot.slane %v711_v18, 5 }
  0x60   : > { %v693_v41 = vshll.u32 %v3365_v4, 16  ;;  %532 = vst.msk [vmem:[#allocation2 + $0x60] sm:$0xff] %vm519_vm0, %v3495_v24  ;;  %v717_v42 = vshll.u32 %v3440_v22, 16  ;;  %v723_v43 = vrot.slane %v721_v33, 4  ;;  %v727_v27 = vshll.u32 %v392_v26, 16 }
  0x61   : > { %1459 = vrot.lane.b32.xlu0 %v3389_v28, %s2934_s13  ;;  %v714_v50 = vor.u32 %v713_v36, %v710_v35  ;;  %v830_v58 = vrot.slane %v828_v29, 4  ;;  %v833_v23 = vrot.slane %v831_v47, 5  ;;  %v837_v62 = vshll.u32 %v3471_v16, 16  ;;  %v2787_v33 = vld [vmem:[%s4330_s2 + $0x10] ss:$0 sps:$4 sm:$0x33]  }
  0x62   : > { %1527 = vrot.lane.b32.xlu1 %v3159_v39, %s2938_s9  ;;  %v813_v39 = vshll.u32 %v3334_v46, 16  ;;  %v3516_v8 = vrot.slane %v697_v2, 4  ;;  %v719_v14 = vrot.slane %v717_v42, 5  ;;  %v843_v0 = vrot.slane %v841_v30, 4  ;;  %2660 = vmatprep.subr.msk.bf16.mxu0 %vm1841_vm7, %v2787_v33 }
  0x63   : > { %v715_v38 = vrot.slane %v714_v50, 4  ;;  %v729_v51 = vrot.slane %v727_v27, 5  ;;  %v834_v1 = vor.u32 %v833_v23, %v830_v58  ;;  %v839_v18 = vrot.slane %v837_v62, 5  ;;  %2661 = vmatprep.subr.msk.bf16.mxu1 %vm1841_vm7, %v2787_v33 }
  0x64   : > { %v3502_v34 = vrot.slane %v813_v39, 5  ;;  %v847_v39 = vshll.u32 %v3505_v32, 16  ;;  %v724_v29 = vor.u32 %v723_v43, %v719_v14  ;;  %v2535_v2 = vrot.slane %v3437_v60, 9  ;;  %v413_v60 = vld [vmem:[%s3041_s11 + $0xb0] sm:$0x1] }
  0x65   : > { %1233 = vrot.lane.b32.xlu0 %v3420_v17, %s2935_s14  ;;  %v1106_v35 = vrot.slane %v3440_v22, 5  ;;  %v720_v30 = vsel %vm3098_vm6, %v715_v38, %v719_v14  ;;  %v835_v36 = vrot.slane %v834_v1, 4  ;;  %v844_v42 = vor.u32 %v843_v0, %v839_v18  ;;  %v408_v38 = vld [vmem:[%s3041_s11 + $0x9c] sm:$0xf]  ;;  %v409_v1 = vld [vmem:[%s3041_s11 + $0xa0] sm:$0xf] }
  0x66   : > { %1301 = vrot.lane.b32.xlu1 %v3250_v44, %s2933_s12  ;;  %v849_v47 = vrot.slane %v847_v39, 5  ;;  %v1109_v27 = vrot.slane %v392_v26, 5  ;;  %v725_v50 = vrot.slane %v724_v29, 4  ;;  %v1843_v62 = vsel %vm1841_vm7, %v2787_v33, 0 }
  0x67   : > { %v1107_v58 = vsel %vm3061_vm5, %v2535_v2, %v1106_v35  ;;  %v1108_v43 = vrot.slane %v1106_v35, 4  ;;  %v840_v22 = vsel %vm3098_vm6, %v835_v36, %v839_v18  ;;  %v845_v23 = vrot.slane %v844_v42, 4  ;;  %2621 = vmatpush3.bf16.msra.mxu0 %v1843_v62  ;;  %v410_v2 = vld [vmem:[%s3041_s11 + $0xa4] sm:$0x1]  ;;  %2659 = vmatpush3.bf16.msra.mxu1 %v1843_v62 }
  0x68   : > { %v730_v26 = vsel %vm3098_vm6, %v725_v50, %v729_v51  ;;  %v2540_v0 = vrot.slane %v3468_v10, 9  ;;  %v1141_v39 = vrot.slane %v3471_v16, 5  ;;  %v1144_v29 = vrot.slane %v3505_v32, 5  ;;  %v411_v50 = vld [vmem:[%s3041_s11 + $0xa8] sm:$0xf] }
  0x69   : > { %1529 = vrot.lane.b32.xlu0 %v3266_v55, %s2938_s9  ;;  %v1110_v14 = vsel %vm3061_vm5, %v1108_v43, %v1109_v27  ;;  %v3548_v18 = vcombine.low %v720_v30, %v730_v26  ;;  %v850_v33 = vsel %vm3098_vm6, %v845_v23, %v849_v47  ;;  %v3562_v30 = vcombine.low %v3162_v40, %v3167_v45  ;;  %v412_v40 = vld [vmem:[%s3041_s11 + $0xac] sm:$0xf] }
  0x6a   : > { %1619 = vrot.lane.b32.xlu1 %v3336_v48, %s2939_s10  ;;  %v3552_v51 = vcombine.low %v1107_v58, %v1110_v14  ;;  %v3556_v10 = vcombine.low %v840_v22, %v850_v33  ;;  %v1142_v16 = vsel %vm3061_vm5, %v2540_v0, %v1141_v39  ;;  %v1143_v35 = vrot.slane %v1141_v39, 4 }
  0x6b   : > { %v3564_v36 = vcombine.low %v408_v38, %v409_v1  ;;  %v852_v47 = vshrl.u32 %v408_v38, 16  ;;  %v855_v42 = vshll.u32 %v408_v38, 16  ;;  %v865_v27 = vshrl.u32 %v409_v1, 16  ;;  %528 = vst.msk [vmem:[#allocation2 + $0x40] sm:$0xff] %vm519_vm0, %v3562_v30 }
  0x6c   : > { %v1145_v32 = vsel %vm3061_vm5, %v1143_v35, %v1144_v29  ;;  %v861_v58 = vshll.u32 %v409_v1, 16  ;;  %v871_v43 = vshll.u32 %v410_v2, 16  ;;  %v2541_v22 = vrot.slane %v408_v38, 9 }
  0x6d   : > { %1303 = vrot.lane.b32.xlu0 %v3288_v63, %s2933_s12  ;;  %v3576_v45 = vcombine.low %v1142_v16, %v1145_v32  ;;  %533 = vst.msk [vmem:[#allocation2 + $0x68] sm:$0xff] %vm519_vm0, %v3564_v36  ;;  %v857_v23 = vrot.slane %v855_v42, 5  ;;  %v867_v62 = vrot.slane %v865_v27, 4  ;;  %v1148_v0 = vrot.slane %v409_v1, 5 }
  0x6e   : > { %1393 = vrot.lane.b32.xlu1 %v3373_v5, %s2937_s27  ;;  %v863_v26 = vrot.slane %v861_v58, 5  ;;  %v873_v14 = vrot.slane %v871_v43, 5  ;;  %v1151_v39 = vrot.slane %v410_v2, 5  ;;  %v3580_v29 = vcombine.low %v411_v50, %v412_v40 }
  0x6f   : > { %v876_v38 = vshrl.u32 %v411_v50, 16  ;;  %v879_v35 = vshll.u32 %v411_v50, 16  ;;  %v1149_v32 = vsel %vm3061_vm5, %v2541_v22, %v1148_v0  ;;  %v889_v42 = vshrl.u32 %v412_v40, 16 }
  0x70   : > { %v868_v16 = vor.u32 %v867_v62, %v863_v26  ;;  %534 = vst.msk [vmem:[#allocation2 + $0x70] sm:$0xff] %vm519_vm0, %v3580_v29  ;;  %v885_v58 = vshll.u32 %v412_v40, 16  ;;  %v895_v22 = vshll.u32 %v413_v60, 16 }
  0x71   : > { %1621 = vrot.lane.b32.xlu0 %v3422_v49, %s2939_s10  ;;  %v878_v2 = vrot.slane %v876_v38, 4  ;;  %v881_v27 = vrot.slane %v879_v35, 5 }
  0x72   : > { %1695 = vrot.lane.b32.xlu1 %v3389_v28, %s2940_s16  ;;  %v869_v43 = vrot.slane %v868_v16, 4  ;;  %v887_v31 = vrot.slane %v885_v58, 5  ;;  %v897_v35 = vrot.slane %v895_v22, 5  ;;  %v2542_v16 = vrot.slane %v411_v50, 9 }
  0x74   : > { %v874_v38 = vsel %vm3098_vm6, %v869_v43, %v873_v14  ;;  %v900_v14 = vshrl.u32 %v414_v19, 16  ;;  %v903_v43 = vshll.u32 %v414_v19, 16 }
  0x75   : > { %979 = vrot.lane.b32.xlu0 %v3336_v48, %s2936_s15  ;;  %v854_v48 = vrot.slane %v852_v47, 4  ;;  %v1150_v47 = vrot.slane %v1148_v0, 4 }
  0x76   : > { %1395 = vrot.lane.b32.xlu1 %v3430_v56, %s2937_s27 }
  0x77   : > { %v858_v33 = vor.u32 %v857_v23, %v854_v48  ;;  %v1152_v48 = vsel %vm3061_vm5, %v1150_v47, %v1151_v39  ;;  %v891_v23 = vrot.slane %v889_v42, 4  ;;  %v1155_v39 = vrot.slane %v412_v40, 5  ;;  %v415_v47 = vld [vmem:[%s3041_s11 + $0xb8] sm:$0xf] }
  0x78   : > { %v3595_v0 = vcombine.low %v1149_v32, %v1152_v48  ;;  %v3610_v48 = vcombine.low %v414_v19, %v415_v47  ;;  %v913_v22 = vshrl.u32 %v415_v47, 16 }
  0x79   : > { %1469 = vrot.lane.b32.xlu0 %v3420_v17, %s2934_s13  ;;  %v859_v1 = vrot.slane %v858_v33, 4  ;;  %v882_v33 = vor.u32 %v881_v27, %v878_v2  ;;  %v892_v42 = vor.u32 %v891_v23, %v887_v31  ;;  %v416_v2 = vld [vmem:[%s3041_s11 + $0xbc] sm:$0x1]  ;;  %v1156_v27 = vsel %vm3061_vm5, %v2542_v16, %v1155_v39  ;;  %s2663_s11 = smul.u32 24, %s3035_s7  ;;  %s4197_s7 = sand.u32 1, %s2915_s19  }
  0x7a   : > { %1697 = vrot.lane.b32.xlu1 %v3432_v57, %s2940_s16  ;;  %v1157_v58 = vrot.slane %v1155_v39, 4  ;;  %4346 = vst [vmem:[#allocation11_spill] sm:$0xff] %v3610_v48  ;;  %535 = vst.msk [vmem:[#allocation2 + $0x78] sm:$0xff] %vm519_vm0, %v3610_v48  ;;  %v909_v23 = vshll.u32 %v415_v47, 16  ;;  %v915_v16 = vrot.slane %v913_v22, 4  ;;  %v695_v39 = vrot.slane %v693_v41, 5 }
  0x7b   : > { %v864_v62 = vsel %vm3098_vm6, %v859_v1, %v863_v26  ;;  %v883_v32 = vrot.slane %v882_v33, 4  ;;  %v1158_v1 = vrot.slane %v413_v60, 5  ;;  %v893_v40 = vrot.slane %v892_v42, 4  ;;  %s3831_s29 = scalar_lea.vmem %s4329_s1, %s2663_s11 }
  0x7c   : > { %v3605_v26 = vcombine.low %v864_v62, %v874_v38  ;;  %v902_v60 = vrot.slane %v900_v14, 4  ;;  %v919_v62 = vshll.u32 %v416_v2, 16  ;;  %v905_v38 = vrot.slane %v903_v43, 5 }
  0x7d   : > { %981 = vrot.lane.b32.xlu0 %v3422_v49, %s2936_s15  ;;  %v888_v50 = vsel %vm3098_vm6, %v883_v32, %v887_v31  ;;  %v898_v31 = vsel %vm3098_vm6, %v893_v40, %v897_v35  ;;  %v911_v42 = vrot.slane %v909_v23, 5  ;;  %v1165_v4 = vrot.slane %v416_v2, 5 }
  0x7e   : > { %1223 = vrot.lane.b32.xlu1 %v3389_v28, %s2935_s14  ;;  %v1159_v28 = vsel %vm3061_vm5, %v1157_v58, %v1158_v1  ;;  %v3628_v32 = vcombine.low %v888_v50, %v898_v31  ;;  %v1162_v1 = vrot.slane %v415_v47, 5  ;;  %v4347_v58 = vshll.u32 %v3450_v3, 16 }
  0x7f   : > { %v3624_v33 = vcombine.low %v1156_v27, %v1159_v28  ;;  %v906_v48 = vor.u32 %v905_v38, %v902_v60  ;;  %v921_v17 = vrot.slane %v919_v62, 5  ;;  %v916_v35 = vor.u32 %v915_v16, %v911_v42 }
  0x80   : > { %v825_v14 = vrot.slane %v4347_v58, 5  ;;  %v2543_v27 = vrot.slane %v414_v19, 9  ;;  %v1164_v40 = vrot.slane %v1162_v1, 4  ;;  %v4348_v41 = vor.u32 %v3454_v12, %v3452_v11 }
  0x81   : > { %1471 = vrot.lane.b32.xlu0 %v3444_v53, %s2934_s13  ;;  %v4349_v50 = vor.u32 %v3459_v15, %v3502_v34  ;;  %v907_v43 = vrot.slane %v906_v48, 4  ;;  %v700_v22 = vor.u32 %v3516_v8, %v695_v39  ;;  %v917_v28 = vrot.slane %v916_v35, 4 }
  0x82   : > { %1539 = vrot.lane.b32.xlu1 %v3288_v63, %s2938_s9  ;;  %v690_v63 = vor.u32 %v3484_v6, %v3482_v21  ;;  %v811_v47 = vrot.slane %v4348_v41, 4  ;;  %v703_v6 = vshll.u32 %v3426_v54, 16  ;;  %v1163_v19 = vsel %vm3061_vm5, %v2543_v27, %v1162_v1 }
  0x83   : > { %v821_v21 = vrot.slane %v4349_v50, 4  ;;  %v912_v11 = vsel %vm3098_vm6, %v907_v43, %v911_v42  ;;  %v922_v54 = vsel %vm3098_vm6, %v917_v28, %v921_v17  ;;  %v701_v60 = vrot.slane %v700_v22, 4 }
  0x84   : > { %v816_v15 = vsel %vm3098_vm6, %v811_v47, %v3502_v34  ;;  %v3665_v2 = vcombine.low %v912_v11, %v922_v54  ;;  %v691_v48 = vrot.slane %v690_v63, 4  ;;  %v705_v23 = vrot.slane %v703_v6, 5 }
  0x85   : > { %1225 = vrot.lane.b32.xlu0 %v3432_v57, %s2935_s14  ;;  %v826_v8 = vsel %vm3098_vm6, %v821_v21, %v825_v14  ;;  %v1134_v62 = vrot.slane %v3334_v46, 5  ;;  %v2539_v31 = vrot.slane %v3327_v37, 9  ;;  %v1137_v42 = vrot.slane %v3450_v3, 5 }
  0x86   : > { %1293 = vrot.lane.b32.xlu1 %v3266_v55, %s2933_s12  ;;  %v1166_v55 = vsel %vm3061_vm5, %v1164_v40, %v1165_v4  ;;  %v2523_v17 = vcombine.low %v816_v15, %v826_v8  ;;  %v696_v34 = vsel %vm3098_vm6, %v691_v48, %v695_v39  ;;  %v706_v38 = vsel %vm3098_vm6, %v701_v60, %v705_v23 }
  0x87   : > { %v3652_v12 = vcombine.low %v1163_v19, %v1166_v55  ;;  %v1136_v16 = vrot.slane %v1134_v62, 4  ;;  %v2518_v46 = vcombine.low %v696_v34, %v706_v38  ;;  %vm1792_vm0 = vcmask 293888  }
  0x89   : > { %1541 = vrot.lane.b32.xlu0 %v3354_v61, %s2938_s9  ;;  %v1138_v37 = vsel %vm3061_vm5, %v1136_v16, %v1137_v42 }
  0x8a   : > { %1631 = vrot.lane.b32.xlu1 %v3430_v56, %s2939_s10 }
  0x8d   : > { %1295 = vrot.lane.b32.xlu0 %v3381_v59, %s2933_s12 }
  0x8e   : > { %1385 = vrot.lane.b32.xlu1 %v3422_v49, %s2937_s27  ;;  %v1135_v49 = vsel %vm3061_vm5, %v2539_v31, %v1134_v62 }
  0x8f   : > { %v2555_v39 = vcombine.low %v1135_v49, %v1138_v37  ;;  %v3843_v37 = vld [vmem:[%s3831_s29 + $0x4] sm:$0xf] }
  0x91   : > { %1633 = vrot.lane.b32.xlu0 %v2523_v17, %s2939_s10 }
  0x92   : > { %1707 = vrot.lane.b32.xlu1 %v3444_v53, %s2940_s16 }
  0x94   : > { %v1288_v3 = vpop.permute.xlu1 %1287 }
  0x95   : > { %991 = vrot.lane.b32.xlu0 %v3430_v56, %s2936_s15  ;;  %v1286_v1 = vpop.permute.xlu0 %1285 }
  0x96   : > { %1387 = vrot.lane.b32.xlu1 %v2518_v46, %s2937_s27 }
  0x99   : > { %1461 = vrot.lane.b32.xlu0 %v3432_v57, %s2934_s13 }
  0x9a   : > { %1709 = vrot.lane.b32.xlu1 %v2555_v39, %s2940_s16 }
  0x9b   : > { %v1454_v58 = vpop.permute.xlu0 %1453 }
  0x9d   : > { %993 = vrot.lane.b32.xlu0 %v2523_v17, %s2936_s15 }
  0x9e   : > { %1235 = vrot.lane.b32.xlu1 %v3444_v53, %s2935_s14  ;;  %v1216_v14 = vpop.permute.xlu1 %1215 }
  0xa1   : > { %1463 = vrot.lane.b32.xlu0 %v3486_v25, %s2934_s13 }
  0xa2   : > { %1531 = vrot.lane.b32.xlu1 %v3381_v59, %s2938_s9  ;;  %v1218_v56 = vpop.permute.xlu1 %1217 }
  0xa3   : > { %v972_v63 = vpop.permute.xlu0 %971 }
  0xa4   : > { %1020 = vst.msk [vmem:[#allocation2] sm:$0xff] %vm1019_vm8, %v972_v63 }
  0xa5   : > { %1264 = vst.msk [vmem:[#allocation2] sm:$0xff] %vm1263_vm9, %v1216_v14  ;;  %1237 = vrot.lane.b32.xlu0 %v2555_v39, %s2935_s14  ;;  %v1364_v14 = vshrl.u32 %v3843_v37, 16 }
  0xa6   : > { %1305 = vrot.lane.b32.xlu1 %v3354_v61, %s2933_s12  ;;  %v1456_v57 = vpop.permute.xlu1 %1455  ;;  %1334 = vst.msk [vmem:[#allocation2] sm:$0xff] %vm1333_vm10, %v1286_v1 }
  0xa7   : > { %v974_v53 = vpop.permute.xlu0 %973 }
  0xa8   : > { %1021 = vst.msk [vmem:[#allocation2 + $0x8] sm:$0xff] %vm1019_vm8, %v974_v53 }
  0xa9   : > { %1265 = vst.msk [vmem:[#allocation2 + $0x8] sm:$0xff] %vm1263_vm9, %v1218_v56  ;;  %1533 = vrot.lane.b32.xlu0 %v3465_v9, %s2938_s9  ;;  %v1360_v56 = vshll.u32 %v3843_v37, 16 }
  0xaa   : > { %1623 = vrot.lane.b32.xlu1 %v2518_v46, %s2939_s10  ;;  %1335 = vst.msk [vmem:[#allocation2 + $0x8] sm:$0xff] %vm1333_vm10, %v1288_v3 }
  0xab   : > { %v1378_v59 = vpop.permute.xlu0 %1377 }
  0xac   : > { %v1380_v35 = vpop.permute.xlu1 %1379  ;;  %1426 = vst.msk [vmem:[#allocation2] sm:$0xff] %vm1425_vm11, %v1378_v59  ;;  %v1362_v59 = vrot.slane %v1360_v56, 5 }
  0xad   : > { %1427 = vst.msk [vmem:[#allocation2 + $0x8] sm:$0xff] %vm1425_vm11, %v1380_v35  ;;  %1307 = vrot.lane.b32.xlu0 %v3495_v24, %s2933_s12  ;;  %v1366_v35 = vrot.slane %v1364_v14, 4 }
  0xae   : > { %1502 = vst.msk [vmem:[#allocation2] sm:$0xff] %vm1501_vm12, %v1454_v58  ;;  %1397 = vrot.lane.b32.xlu1 %v2523_v17, %s2937_s27  ;;  %1503 = vst.msk [vmem:[#allocation2 + $0x8] sm:$0xff] %vm1501_vm12, %v1456_v57  ;;  %v4351_v58 = vld [vmem:[#allocation11_spill] sm:$0xff] }
  0xaf   : > { %v1524_v61 = vpop.permute.xlu0 %1523 }
  0xb0   : > { %v1526_v27 = vpop.permute.xlu1 %1525  ;;  %1572 = vst.msk [vmem:[#allocation2] sm:$0xff] %vm1571_vm13, %v1524_v61 }
  0xb1   : > { %1573 = vst.msk [vmem:[#allocation2 + $0x8] sm:$0xff] %vm1571_vm13, %v1526_v27  ;;  %1625 = vrot.lane.b32.xlu0 %v3548_v18, %s2939_s10  ;;  %v419_v27 = vld [vmem:[%s3831_s29 + $0x8] sm:$0x1] }
  0xb2   : > { %1699 = vrot.lane.b32.xlu1 %v3486_v25, %s2940_s16 }
  0xb3   : > { %v1616_v40 = vpop.permute.xlu0 %1615 }
  0xb4   : > { %v1618_v4 = vpop.permute.xlu1 %1617  ;;  %1664 = vst.msk [vmem:[#allocation2] sm:$0xff] %vm1663_vm14, %v1616_v40 }
  0xb5   : > { %1665 = vst.msk [vmem:[#allocation2 + $0x8] sm:$0xff] %vm1663_vm14, %v1618_v4  ;;  %983 = vrot.lane.b32.xlu0 %v2518_v46, %s2936_s15 }
  0xb6   : > { %1399 = vrot.lane.b32.xlu1 %v3556_v10, %s2937_s27 }
  0xb7   : > { %v1692_v41 = vpop.permute.xlu0 %1691 }
  0xb8   : > { %v976_v47 = vpop.permute.xlu1 %975  ;;  %1740 = vst.msk [vmem:[#allocation2] sm:$0xff] %vm1739_vm15, %v1692_v41  ;;  %v1367_v41 = vor.u32 %v1366_v35, %v1362_v59 }
  0xb9   : > { %1022 = vst.msk [vmem:[#allocation2 + $0x10] sm:$0xff] %vm1019_vm8, %v976_v47  ;;  %1473 = vrot.lane.b32.xlu0 %v2555_v39, %s2934_s13  ;;  %v1370_v47 = vshll.u32 %v419_v27, 16 }
  0xba   : > { %1701 = vrot.lane.b32.xlu1 %v3552_v51, %s2940_s16 }
  0xbb   : > { %v1694_v50 = vpop.permute.xlu0 %1693 }
  0xbc   : > { %v978_v21 = vpop.permute.xlu1 %977  ;;  %1741 = vst.msk [vmem:[#allocation2 + $0x8] sm:$0xff] %vm1739_vm15, %v1694_v50 }
  0xbd   : > { %1023 = vst.msk [vmem:[#allocation2 + $0x18] sm:$0xff] %vm1019_vm8, %v978_v21  ;;  %985 = vrot.lane.b32.xlu0 %v3548_v18, %s2936_s15  ;;  %v3869_v21 = vld [vmem:[%s3831_s29 + $0xc] sm:$0xf] }
  0xbe   : > { %1227 = vrot.lane.b32.xlu1 %v3486_v25, %s2935_s14  ;;  %v2566_v56 = vrot.slane %v3869_v21, 9 }
  0xbf   : > { %v1220_v6 = vpop.permute.xlu0 %1219  ;;  %v1756_v43 = vld [vmem:[#allocation2] sm:$0xff] }
  0xc0   : > { %v1222_v22 = vpop.permute.xlu1 %1221  ;;  %1266 = vst.msk [vmem:[#allocation2 + $0x10] sm:$0xff] %vm1263_vm9, %v1220_v6  ;;  %2622 = vmatprep.mubr.msk.bf16.mxu0 %vm1792_vm0, %v1756_v43  ;;  %v3873_v43 = vld [vmem:[%s3831_s29 + $0x10] sm:$0xf] }
  0xc1   : > { %1267 = vst.msk [vmem:[#allocation2 + $0x18] sm:$0xff] %vm1263_vm9, %v1222_v22  ;;  %1475 = vrot.lane.b32.xlu0 %v3576_v45, %s2934_s13 }
  0xc2   : > { %1543 = vrot.lane.b32.xlu1 %v3495_v24, %s2938_s9 }
  0xc3   : > { %v1290_v28 = vpop.permute.xlu0 %1289  ;;  %v1757_v19 = vld [vmem:[#allocation2 + $0x8] sm:$0xff] }
  0xc4   : > { %v1292_v55 = vpop.permute.xlu1 %1291  ;;  %1336 = vst.msk [vmem:[#allocation2 + $0x10] sm:$0xff] %vm1333_vm10, %v1290_v28  ;;  %2623 = vmatmul.mubr.msk.bf16.vlgmr.msra.gmra.mrb[0].mxu0 %vm1792_vm0, %v1757_v19  ;;  %v1372_v28 = vrot.slane %v1370_v47, 5  ;;  %v1589_v19 = vshrl.u32 %v3869_v21, 16 }
  0xc5   : > { %1337 = vst.msk [vmem:[#allocation2 + $0x18] sm:$0xff] %vm1333_vm10, %v1292_v55  ;;  %1229 = vrot.lane.b32.xlu0 %v3552_v51, %s2935_s14  ;;  %v1592_v55 = vshll.u32 %v3869_v21, 16 }
  0xc6   : > { %1297 = vrot.lane.b32.xlu1 %v3465_v9, %s2933_s12 }
  0xc7   : > { %v1382_v25 = vpop.permute.xlu0 %1381 }
  0xc8   : > { %v988_v11 = vpop.permute.xlu1 %987  ;;  %1428 = vst.msk [vmem:[#allocation2 + $0x10] sm:$0xff] %vm1425_vm11, %v1382_v25 }
  0xc9   : > { %1028 = vst.msk [vmem:[#allocation2 + $0x40] sm:$0xff] %vm1019_vm8, %v988_v11  ;;  %1545 = vrot.lane.b32.xlu0 %v3564_v36, %s2938_s9  ;;  %v1445_v11 = vrot.slane %v3843_v37, 5 }
  0xca   : > { %1635 = vrot.lane.b32.xlu1 %v3556_v10, %s2939_s10 }
  0xcb   : > { %v1384_v24 = vpop.permute.xlu0 %1383 }
  0xcc   : > { %v1458_v54 = vpop.permute.xlu1 %1457  ;;  %1429 = vst.msk [vmem:[#allocation2 + $0x18] sm:$0xff] %vm1425_vm11, %v1384_v24  ;;  %v1602_v24 = vshrl.u32 %v3873_v43, 16 }
  0xcd   : > { %1504 = vst.msk [vmem:[#allocation2 + $0x10] sm:$0xff] %vm1501_vm12, %v1458_v54  ;;  %1299 = vrot.lane.b32.xlu0 %v3562_v30, %s2933_s12  ;;  %v1598_v54 = vshll.u32 %v3873_v43, 16 }
  0xce   : > { %1389 = vrot.lane.b32.xlu1 %v3548_v18, %s2937_s27 }
  0xcf   : > { %v990_v9 = vpop.permute.xlu0 %989 }
  0xd0   : > { %v1232_v15 = vpop.permute.xlu1 %1231  ;;  %1029 = vst.msk [vmem:[#allocation2 + $0x48] sm:$0xff] %vm1019_vm8, %v990_v9 }
  0xd1   : > { %1272 = vst.msk [vmem:[#allocation2 + $0x40] sm:$0xff] %vm1263_vm9, %v1232_v15  ;;  %1637 = vrot.lane.b32.xlu0 %v3605_v26, %s2939_s10 }
  0xd2   : > { %1711 = vrot.lane.b32.xlu1 %v3576_v45, %s2940_s16 }
  0xd3   : > { %v1460_v8 = vpop.permute.xlu0 %1459 }
  0xd4   : > { %v1528_v48 = vpop.permute.xlu1 %1527  ;;  %1505 = vst.msk [vmem:[#allocation2 + $0x18] sm:$0xff] %vm1501_vm12, %v1460_v8 }
  0xd5   : > { %1574 = vst.msk [vmem:[#allocation2 + $0x10] sm:$0xff] %vm1571_vm13, %v1528_v48  ;;  %995 = vrot.lane.b32.xlu0 %v3556_v10, %s2936_s15 }
  0xd6   : > { %1391 = vrot.lane.b32.xlu1 %v3296_v7, %s2937_s27 }
  0xd7   : > { %v1234_v18 = vpop.permute.xlu0 %1233 }
  0xd8   : > { %v1302_v60 = vpop.permute.xlu1 %1301  ;;  %1273 = vst.msk [vmem:[#allocation2 + $0x48] sm:$0xff] %vm1263_vm9, %v1234_v18 }
  0xd9   : > { %1342 = vst.msk [vmem:[#allocation2 + $0x40] sm:$0xff] %vm1333_vm10, %v1302_v60  ;;  %1465 = vrot.lane.b32.xlu0 %v3552_v51, %s2934_s13 }
  0xda   : > { %1713 = vrot.lane.b32.xlu1 %v3595_v0, %s2940_s16 }
  0xdb   : > { %v1530_v23 = vpop.permute.xlu0 %1529 }
  0xdc   : > { %v1620_v62 = vpop.permute.xlu1 %1619  ;;  %1575 = vst.msk [vmem:[#allocation2 + $0x18] sm:$0xff] %vm1571_vm13, %v1530_v23  ;;  %v1591_v23 = vrot.slane %v1589_v19, 4 }
  0xdd   : > { %1666 = vst.msk [vmem:[#allocation2 + $0x10] sm:$0xff] %vm1663_vm14, %v1620_v62  ;;  %997 = vrot.lane.b32.xlu0 %v3605_v26, %s2936_s15  ;;  %v1594_v62 = vrot.slane %v1592_v55, 5 }
  0xde   : > { %1239 = vrot.lane.b32.xlu1 %v3576_v45, %s2935_s14 }
  0xdf   : > { %v1304_v10 = vpop.permute.xlu0 %1303 }
  0xe0   : > { %v1394_v17 = vpop.permute.xlu1 %1393  ;;  %1343 = vst.msk [vmem:[#allocation2 + $0x48] sm:$0xff] %vm1333_vm10, %v1304_v10  ;;  %v1447_v10 = vrot.slane %v1445_v11, 4 }
  0xe1   : > { %1434 = vst.msk [vmem:[#allocation2 + $0x40] sm:$0xff] %vm1425_vm11, %v1394_v17  ;;  %1467 = vrot.lane.b32.xlu0 %v3311_v20, %s2934_s13  ;;  %v1448_v17 = vrot.slane %v419_v27, 5 }
  0xe2   : > { %1535 = vrot.lane.b32.xlu1 %v3562_v30, %s2938_s9 }
  0xe3   : > { %v1622_v51 = vpop.permute.xlu0 %1621 }
  0xe4   : > { %v1696_v31 = vpop.permute.xlu1 %1695  ;;  %1667 = vst.msk [vmem:[#allocation2 + $0x18] sm:$0xff] %vm1663_vm14, %v1622_v51  ;;  %v1600_v51 = vrot.slane %v1598_v54, 5 }
  0xe5   : > { %1742 = vst.msk [vmem:[#allocation2 + $0x10] sm:$0xff] %vm1739_vm15, %v1696_v31  ;;  %1241 = vrot.lane.b32.xlu0 %v3595_v0, %s2935_s14  ;;  %v1604_v31 = vrot.slane %v1602_v24, 4 }
  0xe6   : > { %1309 = vrot.lane.b32.xlu1 %v3564_v36, %s2933_s12 }
  0xe7   : > { %v980_v45 = vpop.permute.xlu0 %979 }
  0xe8   : > { %v1396_v34 = vpop.permute.xlu1 %1395  ;;  %1024 = vst.msk [vmem:[#allocation2 + $0x20] sm:$0xff] %vm1019_vm8, %v980_v45 }
  0xe9   : > { %1435 = vst.msk [vmem:[#allocation2 + $0x48] sm:$0xff] %vm1425_vm11, %v1396_v34  ;;  %1537 = vrot.lane.b32.xlu0 %v3250_v44, %s2938_s9  ;;  %v422_v34 = vld [vmem:[%s3831_s29 + $0x14] sm:$0x1] }
  0xea   : > { %1627 = vrot.lane.b32.xlu1 %v3296_v7, %s2939_s10 }
  0xeb   : > { %v1470_v30 = vpop.permute.xlu0 %1469 }
  0xec   : > { %v1698_v38 = vpop.permute.xlu1 %1697  ;;  %1510 = vst.msk [vmem:[#allocation2 + $0x40] sm:$0xff] %vm1501_vm12, %v1470_v30  ;;  %v1758_v16 = vld [vmem:[#allocation2 + $0x10] sm:$0xff] }
  0xed   : > { %1743 = vst.msk [vmem:[#allocation2 + $0x18] sm:$0xff] %vm1739_vm15, %v1698_v38  ;;  %1311 = vrot.lane.b32.xlu0 %v3580_v29, %s2933_s12  ;;  %2626 = vmatprep.mubr.msk.bf16.mxu0 %vm1792_vm0, %v1758_v16  ;;  %v1595_v38 = vor.u32 %v1594_v62, %v1591_v23 }
  0xee   : > { %1401 = vrot.lane.b32.xlu1 %v3605_v26, %s2937_s27  ;;  %v4350_v26 = vld [vmem:[#allocation10_spill] sm:$0xff] }
  0xef   : > { %v982_v44 = vpop.permute.xlu0 %981 }
  0xf0   : > { %v1224_v36 = vpop.permute.xlu1 %1223  ;;  %1025 = vst.msk [vmem:[#allocation2 + $0x28] sm:$0xff] %vm1019_vm8, %v982_v44 }
  0xf1   : > { %1268 = vst.msk [vmem:[#allocation2 + $0x20] sm:$0xff] %vm1263_vm9, %v1224_v36  ;;  %1629 = vrot.lane.b32.xlu0 %v3373_v5, %s2939_s10  ;;  %v1449_v36 = vsel %vm3061_vm5, %v1447_v10, %v1448_v17 }
  0xf2   : > { %1703 = vrot.lane.b32.xlu1 %v3311_v20, %s2940_s16 }
  0xf3   : > { %v1472_v7 = vpop.permute.xlu0 %1471 }
  0xf4   : > { %v1540_v42 = vpop.permute.xlu1 %1539  ;;  %1511 = vst.msk [vmem:[#allocation2 + $0x48] sm:$0xff] %vm1501_vm12, %v1472_v7  ;;  %v1759_v46 = vld [vmem:[#allocation2 + $0x18] sm:$0xff]  ;;  %v1605_v7 = vor.u32 %v1604_v31, %v1600_v51 }
  0xf5   : > { %1580 = vst.msk [vmem:[#allocation2 + $0x40] sm:$0xff] %vm1571_vm13, %v1540_v42  ;;  %2627 = vmatmul.mubr.msk.bf16.gmra.mrb[4].mxu0 %vm1792_vm0, %v1759_v46  ;;  %1403 = vrot.lane.b32.xlu0 %v3628_v32, %s2937_s27  ;;  %v1608_v42 = vshll.u32 %v422_v34, 16 }
  0xf6   : > { %1477 = vrot.lane.b32.xlu1 %v3595_v0, %s2934_s13  ;;  %v3840_v0 = vld [vmem:[%s3831_s29] sm:$0xf] }
  0xf7   : > { %v1226_v5 = vpop.permute.xlu0 %1225  ;;  %v1351_v1 = vshrl.u32 %v3840_v0, 16  ;;  %v1354_v3 = vshll.u32 %v3840_v0, 16  ;;  %v2560_v8 = vcombine.low %v3840_v0, %v3843_v37  ;;  %v2562_v60 = vrot.slane %v3840_v0, 9 }
  0xf8   : > { %v1294_v20 = vpop.permute.xlu1 %1293  ;;  %1269 = vst.msk [vmem:[#allocation2 + $0x28] sm:$0xff] %vm1263_vm9, %v1226_v5  ;;  %v1610_v37 = vrot.slane %v1608_v42, 5 }
  0xf9   : > { %1338 = vst.msk [vmem:[#allocation2 + $0x20] sm:$0xff] %vm1333_vm10, %v1294_v20  ;;  %1705 = vrot.lane.b32.xlu0 %v4350_v26, %s2940_s16  ;;  %v1356_v53 = vrot.slane %v1354_v3, 5  ;;  %v1446_v44 = vsel %vm3061_vm5, %v2562_v60, %v1445_v11  ;;  %v1596_v26 = vrot.slane %v1595_v38, 4 }
  0xfa   : > { %1479 = vrot.lane.b32.xlu1 %v3624_v33, %s2934_s13  ;;  %v2563_v20 = vcombine.low %v1446_v44, %v1449_v36 }
  0xfb   : > { %v1542_v49 = vpop.permute.xlu0 %1541  ;;  %v1601_v3 = vsel %vm3098_vm6, %v1596_v26, %v1600_v51 }
  0xfc   : > { %v1632_v39 = vpop.permute.xlu1 %1631  ;;  %1581 = vst.msk [vmem:[#allocation2 + $0x48] sm:$0xff] %vm1571_vm13, %v1542_v49  ;;  %v1606_v49 = vrot.slane %v1605_v7, 4 }
  0xfd   : > { %1672 = vst.msk [vmem:[#allocation2 + $0x40] sm:$0xff] %vm1663_vm14, %v1632_v39  ;;  %1547 = vrot.lane.b32.xlu0 %v3580_v29, %s2938_s9  ;;  %v1353_v29 = vrot.slane %v1351_v1, 4  ;;  %v1683_v39 = vrot.slane %v3873_v43, 5 }
  0xfe   : > { %1549 = vrot.lane.b32.xlu1 %v4351_v58, %s2938_s9  ;;  %v1611_v14 = vsel %vm3098_vm6, %v1606_v49, %v1610_v37 }
  0xff   : > { %v1296_v63 = vpop.permute.xlu0 %1295  ;;  %v1357_v4 = vor.u32 %v1356_v53, %v1353_v29 }
 0x100   : > { %v1386_v57 = vpop.permute.xlu1 %1385  ;;  %1339 = vst.msk [vmem:[#allocation2 + $0x28] sm:$0xff] %vm1333_vm10, %v1296_v63  ;;  %v1685_v63 = vrot.slane %v1683_v39, 4 }
 0x101   : > { %1430 = vst.msk [vmem:[#allocation2 + $0x20] sm:$0xff] %vm1425_vm11, %v1386_v57  ;;  %1639 = vrot.lane.b32.xlu0 %v3628_v32, %s2939_s10  ;;  %v1358_v22 = vrot.slane %v1357_v4, 4  ;;  %v1686_v57 = vrot.slane %v422_v34, 5 }
 0x102   : > { %1641 = vrot.lane.b32.xlu1 %v3665_v2, %s2939_s10 }
 0x103   : > { %v1634_v61 = vpop.permute.xlu0 %1633  ;;  %v1363_v48 = vsel %vm3098_vm6, %v1358_v22, %v1362_v59  ;;  %v1684_v59 = vsel %vm3061_vm5, %v2566_v56, %v1683_v39  ;;  %v1687_v52 = vsel %vm3061_vm5, %v1685_v63, %v1686_v57 }
 0x104   : > { %v1708_v40 = vpop.permute.xlu1 %1707  ;;  %1673 = vst.msk [vmem:[#allocation2 + $0x48] sm:$0xff] %vm1663_vm14, %v1634_v61  ;;  %v2567_v61 = vcombine.low %v1684_v59, %v1687_v52 }
 0x105   : > { %1748 = vst.msk [vmem:[#allocation2 + $0x40] sm:$0xff] %vm1739_vm15, %v1708_v40  ;;  %1715 = vrot.lane.b32.xlu0 %v3624_v33, %s2940_s16 }
 0x106   : > { %999 = vrot.lane.b32.xlu1 %v3628_v32, %s2936_s15  ;;  %v1368_v32 = vrot.slane %v1367_v41, 4 }
 0x107   : > { %v992_v50 = vpop.permute.xlu0 %991 }
 0x108   : > { %v1388_v6 = vpop.permute.xlu1 %1387  ;;  %1030 = vst.msk [vmem:[#allocation2 + $0x50] sm:$0xff] %vm1019_vm8, %v992_v50  ;;  %v1373_v18 = vsel %vm3098_vm6, %v1368_v32, %v1372_v28 }
 0x109   : > { %1431 = vst.msk [vmem:[#allocation2 + $0x28] sm:$0xff] %vm1425_vm11, %v1388_v6  ;;  %1717 = vrot.lane.b32.xlu0 %v3652_v12, %s2940_s16  ;;  %v2561_v30 = vcombine.low %v1363_v48, %v1373_v18 }
 0x10a   : > { %1001 = vrot.lane.b32.xlu1 %v3665_v2, %s2936_s15 }
 0x10b   : > { %v1462_v25 = vpop.permute.xlu0 %1461 }
 0x10c   : > { %v1710_v9 = vpop.permute.xlu1 %1709  ;;  %1506 = vst.msk [vmem:[#allocation2 + $0x20] sm:$0xff] %vm1501_vm12, %v1462_v25  ;;  %v1764_v15 = vld [vmem:[#allocation2 + $0x40] sm:$0xff] }
 0x10d   : > { %1749 = vst.msk [vmem:[#allocation2 + $0x48] sm:$0xff] %vm1739_vm15, %v1710_v9  ;;  %1243 = vrot.lane.b32.xlu0 %v3624_v33, %s2935_s14  ;;  %2638 = vmatprep.mubr.msk.bf16.mxu1 %vm1792_vm0, %v1764_v15 }
 0x10e   : > { %1245 = vrot.lane.b32.xlu1 %v3652_v12, %s2935_s14  ;;  %s324_s14 = scalar_lea.vmem [#allocation5], %s4197_s7 }
 0x10f   : > { %v994_v33 = vpop.permute.xlu0 %993  ;;  %s2295_s15 = sshll.u32 %s324_s14, 4  ;;  %s4213_s15 = int_to_ptr.vmem [resolvable:$true] %s2295_s15 }
 0x110   : > { %v1236_v45 = vpop.permute.xlu1 %1235  ;;  %1031 = vst.msk [vmem:[#allocation2 + $0x58] sm:$0xff] %vm1019_vm8, %v994_v33 }
 0x111   : > { %1274 = vst.msk [vmem:[#allocation2 + $0x50] sm:$0xff] %vm1263_vm9, %v1236_v45  ;;  %1313 = vrot.lane.b32.xlu0 %v4351_v58, %s2933_s12 }
 0x112   : > { %1315 = vrot.lane.b32.xlu1 %v2560_v8, %s2933_s12  ;;  %s4201_s12 = sand.u32 1, %s2487_s24  }
 0x113   : > { %v1464_v16 = vpop.permute.xlu0 %1463  ;;  %s2259_s29 = scalar_lea.sflag [#allocation6], %s4201_s12 }
 0x114   : > { %v1532_v46 = vpop.permute.xlu1 %1531  ;;  %1507 = vst.msk [vmem:[#allocation2 + $0x28] sm:$0xff] %vm1501_vm12, %v1464_v16  ;;  %v1765_v5 = vld [vmem:[#allocation2 + $0x48] sm:$0xff] }
 0x115   : > { %1576 = vst.msk [vmem:[#allocation2 + $0x20] sm:$0xff] %vm1571_vm13, %v1532_v46  ;;  %2639 = vmatmul.mubr.msk.bf16.vlgmr.msra.gmra.mrb[0].mxu1 %vm1792_vm0, %v1765_v5  ;;  %1405 = vrot.lane.b32.xlu0 %v3665_v2, %s2937_s27  ;;  %v2564_v2 = vcombine.low %v3869_v21, %v3873_v43 }
 0x116   : > { %1407 = vrot.lane.b32.xlu1 %v2561_v30, %s2937_s27  ;;  %s4338_s27 = scalar_lea.vmem [#allocation7], %s4197_s7 }
 0x117   : > { %v1238_v0 = vpop.permute.xlu0 %1237 }
 0x118   : > { %v1306_v1 = vpop.permute.xlu1 %1305  ;;  %1275 = vst.msk [vmem:[#allocation2 + $0x58] sm:$0xff] %vm1263_vm9, %v1238_v0 }
 0x119   : > { %1344 = vst.msk [vmem:[#allocation2 + $0x50] sm:$0xff] %vm1333_vm10, %v1306_v1  ;;  %1481 = vrot.lane.b32.xlu0 %v3652_v12, %s2934_s13  ;;  %v2565_v12 = vcombine.low %v1601_v3, %v1611_v14 }
 0x11a   : > { %1483 = vrot.lane.b32.xlu1 %v2563_v20, %s2934_s13  ;;  %s2591_s13 = sshll.u32 %s2923_s21, 4 }
 0x11b   : > { %v1534_v58 = vpop.permute.xlu0 %1533  ;;  %s4211_s11 = scalar_lea.hbm %s4332_s4, %s2591_s13  ;;  %s4219_s17 = scalar_lea.hbm %s4333_s5, %s2591_s13 }
 0x11c   : > { %v1624_v29 = vpop.permute.xlu1 %1623  ;;  %1577 = vst.msk [vmem:[#allocation2 + $0x28] sm:$0xff] %vm1571_vm13, %v1534_v58 }
 0x11d   : > { %1668 = vst.msk [vmem:[#allocation2 + $0x20] sm:$0xff] %vm1663_vm14, %v1624_v29  ;;  %1551 = vrot.lane.b32.xlu0 %v2560_v8, %s2938_s9 }
 0x11e   : > { %1553 = vrot.lane.b32.xlu1 %v2564_v2, %s2938_s9  ;;  %s2310_s9 = sshll.u32 %s4338_s27, 4  ;;  %s4221_s9 = int_to_ptr.vmem [resolvable:$true] %s2310_s9 }
 0x11f   : > { %v1308_v53 = vpop.permute.xlu0 %1307 }
 0x120   : > { %v1398_v35 = vpop.permute.xlu1 %1397  ;;  %1345 = vst.msk [vmem:[#allocation2 + $0x58] sm:$0xff] %vm1333_vm10, %v1308_v53 }
 0x121   : > { %1436 = vst.msk [vmem:[#allocation2 + $0x50] sm:$0xff] %vm1425_vm11, %v1398_v35  ;;  %1643 = vrot.lane.b32.xlu0 %v2561_v30, %s2939_s10 }
 0x122   : > { %1645 = vrot.lane.b32.xlu1 %v2565_v12, %s2939_s10  ;;  %s2793_s10 = scalar_lea.vmem %s4213_s15, 16 }
 0x123   : > { %v1626_v27 = vpop.permute.xlu0 %1625  ;;  %p2794_p12 = scmp.ne.s32.totalorder %s4213_s15, %s2793_s10 }
 0x124   : > { %v1700_v40 = vpop.permute.xlu1 %1699  ;;  %1669 = vst.msk [vmem:[#allocation2 + $0x28] sm:$0xff] %vm1663_vm14, %v1626_v27 }
 0x125   : > { %1744 = vst.msk [vmem:[#allocation2 + $0x20] sm:$0xff] %vm1739_vm15, %v1700_v40  ;;  %1719 = vrot.lane.b32.xlu0 %v2563_v20, %s2940_s16  ;;  %p2795_p13 = pnand %p2794_p12, %p3016_p4 }
 0x126   : > { %1721 = vrot.lane.b32.xlu1 %v2567_v61, %s2940_s16  ;;  %s2941_s16 = smov [#allocation5]  }
 0x127   : > { %v984_v13 = vpop.permute.xlu0 %983  ;;  %p2796_p0 = pneg %p2795_p13  ;;  %s2797_s25 = sshll.u32 %s2941_s16, 4  ;;  %s2798_s25 = int_to_ptr.vmem [resolvable:$false] %s2797_s25 }
 0x128   : > { %v1400_v4 = vpop.permute.xlu1 %1399  ;;  %1026 = vst.msk [vmem:[#allocation2 + $0x30] sm:$0xff] %vm1019_vm8, %v984_v13  ;;  %s2799_s27 = scalar_lea.vmem %s2798_s25, 32  ;;  %p2800_p1 = scmp.lt.s32.totalorder %s4213_s15, %s2798_s25 }
 0x129   : > { %1437 = vst.msk [vmem:[#allocation2 + $0x58] sm:$0xff] %vm1425_vm11, %v1400_v4  ;;  %p2801_p2 = scmp.lt.s32.totalorder %s2799_s27, %s2793_s10 }
 0x12b   : > { %v1474_v41 = vpop.permute.xlu0 %1473  ;;  %p2802_p3 = por %p2801_p2, %p2800_p1 }
 0x12c   : > { %v1702_v47 = vpop.permute.xlu1 %1701  ;;  %1512 = vst.msk [vmem:[#allocation2 + $0x50] sm:$0xff] %vm1501_vm12, %v1474_v41  ;;  %v1760_v50 = vld [vmem:[#allocation2 + $0x20] sm:$0xff] }
 0x12d   : > { %1745 = vst.msk [vmem:[#allocation2 + $0x28] sm:$0xff] %vm1739_vm15, %v1702_v47  ;;  %2630 = vmatprep.mubr.msk.bf16.mxu0 %vm1792_vm0, %v1760_v50  ;;  %p2803_p5 = pnand %p2802_p3, %p2796_p0 }
 0x12f   : > { %v986_v21 = vpop.permute.xlu0 %985 }
 0x130   : > { %v1228_v6 = vpop.permute.xlu1 %1227  ;;  %1027 = vst.msk [vmem:[#allocation2 + $0x38] sm:$0xff] %vm1019_vm8, %v986_v21 }
 0x131   : > { %1270 = vst.msk [vmem:[#allocation2 + $0x30] sm:$0xff] %vm1263_vm9, %v1228_v6 }
 0x133   : > { %v1476_v43 = vpop.permute.xlu0 %1475 }
 0x134   : > { %v1544_v22 = vpop.permute.xlu1 %1543  ;;  %1513 = vst.msk [vmem:[#allocation2 + $0x58] sm:$0xff] %vm1501_vm12, %v1476_v43  ;;  %v1761_v32 = vld [vmem:[#allocation2 + $0x28] sm:$0xff] }
 0x135   : > { %1582 = vst.msk [vmem:[#allocation2 + $0x50] sm:$0xff] %vm1571_vm13, %v1544_v22  ;;  %2631 = vmatmul.mubr.msk.bf16.gmra.mrb[8].mxu0 %vm1792_vm0, %v1761_v32 }
 0x137   : > { %v1230_v28 = vpop.permute.xlu0 %1229 }
 0x138   : > { %v1298_v19 = vpop.permute.xlu1 %1297  ;;  %1271 = vst.msk [vmem:[#allocation2 + $0x38] sm:$0xff] %vm1263_vm9, %v1230_v28 }
 0x139   : > { %1340 = vst.msk [vmem:[#allocation2 + $0x30] sm:$0xff] %vm1333_vm10, %v1298_v19 }
 0x13b   : > { %v1546_v55 = vpop.permute.xlu0 %1545 }
 0x13c   : > { %v1636_v25 = vpop.permute.xlu1 %1635  ;;  %1583 = vst.msk [vmem:[#allocation2 + $0x58] sm:$0xff] %vm1571_vm13, %v1546_v55 }
 0x13d   : > { %1674 = vst.msk [vmem:[#allocation2 + $0x50] sm:$0xff] %vm1663_vm14, %v1636_v25 }
 0x13f   : > { %v1300_v11 = vpop.permute.xlu0 %1299 }
 0x140   : > { %v1390_v24 = vpop.permute.xlu1 %1389  ;;  %1341 = vst.msk [vmem:[#allocation2 + $0x38] sm:$0xff] %vm1333_vm10, %v1300_v11 }
 0x141   : > { %1432 = vst.msk [vmem:[#allocation2 + $0x30] sm:$0xff] %vm1425_vm11, %v1390_v24 }
 0x143   : > { %v1638_v54 = vpop.permute.xlu0 %1637 }
 0x144   : > { %v1712_v9 = vpop.permute.xlu1 %1711  ;;  %1675 = vst.msk [vmem:[#allocation2 + $0x58] sm:$0xff] %vm1663_vm14, %v1638_v54 }
 0x145   : > { %1750 = vst.msk [vmem:[#allocation2 + $0x50] sm:$0xff] %vm1739_vm15, %v1712_v9 }
 0x147   : > { %v996_v15 = vpop.permute.xlu0 %995 }
 0x148   : > { %v1392_v8 = vpop.permute.xlu1 %1391  ;;  %1032 = vst.msk [vmem:[#allocation2 + $0x60] sm:$0xff] %vm1019_vm8, %v996_v15 }
 0x149   : > { %1433 = vst.msk [vmem:[#allocation2 + $0x38] sm:$0xff] %vm1425_vm11, %v1392_v8 }
 0x14b   : > { %v1466_v48 = vpop.permute.xlu0 %1465 }
 0x14c   : > { %v1714_v18 = vpop.permute.xlu1 %1713  ;;  %1508 = vst.msk [vmem:[#allocation2 + $0x30] sm:$0xff] %vm1501_vm12, %v1466_v48  ;;  %v1766_v60 = vld [vmem:[#allocation2 + $0x50] sm:$0xff] }
 0x14d   : > { %1751 = vst.msk [vmem:[#allocation2 + $0x58] sm:$0xff] %vm1739_vm15, %v1714_v18  ;;  %2642 = vmatprep.mubr.msk.bf16.mxu1 %vm1792_vm0, %v1766_v60 }
 0x14f   : > { %v998_v23 = vpop.permute.xlu0 %997 }
 0x150   : > { %1033 = vst.msk [vmem:[#allocation2 + $0x68] sm:$0xff] %vm1019_vm8, %v998_v23  ;;  %v1240_v62 = vpop.permute.xlu1 %1239 }
 0x151   : > { %1276 = vst.msk [vmem:[#allocation2 + $0x60] sm:$0xff] %vm1263_vm9, %v1240_v62 }
 0x153   : > { %v1468_v33 = vpop.permute.xlu0 %1467 }
 0x154   : > { %1509 = vst.msk [vmem:[#allocation2 + $0x38] sm:$0xff] %vm1501_vm12, %v1468_v33  ;;  %v1536_v10 = vpop.permute.xlu1 %1535  ;;  %v1767_v17 = vld [vmem:[#allocation2 + $0x58] sm:$0xff] }
 0x155   : > { %1578 = vst.msk [vmem:[#allocation2 + $0x30] sm:$0xff] %vm1571_vm13, %v1536_v10  ;;  %2643 = vmatmul.mubr.msk.bf16.gmra.mrb[4].mxu1 %vm1792_vm0, %v1767_v17 }
 0x157   : > { %v1242_v51 = vpop.permute.xlu0 %1241 }
 0x158   : > { %1277 = vst.msk [vmem:[#allocation2 + $0x68] sm:$0xff] %vm1263_vm9, %v1242_v51  ;;  %v1310_v31 = vpop.permute.xlu1 %1309 }
 0x159   : > { %1346 = vst.msk [vmem:[#allocation2 + $0x60] sm:$0xff] %vm1333_vm10, %v1310_v31 }
 0x15b   : > { %v1538_v45 = vpop.permute.xlu0 %1537 }
 0x15c   : > { %1579 = vst.msk [vmem:[#allocation2 + $0x38] sm:$0xff] %vm1571_vm13, %v1538_v45  ;;  %v1628_v34 = vpop.permute.xlu1 %1627 }
 0x15d   : > { %1670 = vst.msk [vmem:[#allocation2 + $0x30] sm:$0xff] %vm1663_vm14, %v1628_v34 }
 0x15f   : > { %v1312_v30 = vpop.permute.xlu0 %1311 }
 0x160   : > { %1347 = vst.msk [vmem:[#allocation2 + $0x68] sm:$0xff] %vm1333_vm10, %v1312_v30  ;;  %v1402_v38 = vpop.permute.xlu1 %1401 }
 0x161   : > { %1438 = vst.msk [vmem:[#allocation2 + $0x60] sm:$0xff] %vm1425_vm11, %v1402_v38 }
 0x163   : > { %v1630_v16 = vpop.permute.xlu0 %1629 }
 0x164   : > { %1671 = vst.msk [vmem:[#allocation2 + $0x38] sm:$0xff] %vm1663_vm14, %v1630_v16  ;;  %v1704_v44 = vpop.permute.xlu1 %1703 }
 0x165   : > { %1746 = vst.msk [vmem:[#allocation2 + $0x30] sm:$0xff] %vm1739_vm15, %v1704_v44 }
 0x167   : > { %v1404_v36 = vpop.permute.xlu0 %1403 }
 0x168   : > { %1439 = vst.msk [vmem:[#allocation2 + $0x68] sm:$0xff] %vm1425_vm11, %v1404_v36  ;;  %v1478_v7 = vpop.permute.xlu1 %1477 }
 0x169   : > { %1514 = vst.msk [vmem:[#allocation2 + $0x60] sm:$0xff] %vm1501_vm12, %v1478_v7 }
 0x16b   : > { %v1706_v42 = vpop.permute.xlu0 %1705 }
 0x16c   : > { %1747 = vst.msk [vmem:[#allocation2 + $0x38] sm:$0xff] %vm1739_vm15, %v1706_v42  ;;  %v1480_v46 = vpop.permute.xlu1 %1479  ;;  %v1762_v5 = vld [vmem:[#allocation2 + $0x30] sm:$0xff] }
 0x16d   : > { %1515 = vst.msk [vmem:[#allocation2 + $0x68] sm:$0xff] %vm1501_vm12, %v1480_v46  ;;  %2634 = vmatprep.mubr.msk.bf16.mxu0 %vm1792_vm0, %v1762_v5 }
 0x16f   : > { %v1548_v20 = vpop.permute.xlu0 %1547 }
 0x170   : > { %1584 = vst.msk [vmem:[#allocation2 + $0x60] sm:$0xff] %vm1571_vm13, %v1548_v20  ;;  %v1550_v26 = vpop.permute.xlu1 %1549 }
 0x171   : > { %1585 = vst.msk [vmem:[#allocation2 + $0x68] sm:$0xff] %vm1571_vm13, %v1550_v26 }
 0x173   : > { %v1640_v0 = vpop.permute.xlu0 %1639  ;;  %v1763_v49 = vld [vmem:[#allocation2 + $0x38] sm:$0xff] }
 0x174   : > { %1676 = vst.msk [vmem:[#allocation2 + $0x60] sm:$0xff] %vm1663_vm14, %v1640_v0  ;;  %v1642_v37 = vpop.permute.xlu1 %1641  ;;  %2635 = vmatmul.mubr.msk.bf16.gmra.mrb[12].mxu0 %vm1792_vm0, %v1763_v49 }
 0x175   : > { %1677 = vst.msk [vmem:[#allocation2 + $0x68] sm:$0xff] %vm1663_vm14, %v1642_v37 }
 0x177   : > { %v1716_v39 = vpop.permute.xlu0 %1715 }
 0x178   : > { %1752 = vst.msk [vmem:[#allocation2 + $0x60] sm:$0xff] %vm1739_vm15, %v1716_v39  ;;  %v1000_v1 = vpop.permute.xlu1 %999 }
 0x179   : > { %1034 = vst.msk [vmem:[#allocation2 + $0x70] sm:$0xff] %vm1019_vm8, %v1000_v1 }
 0x17b   : > { %v1718_v2 = vpop.permute.xlu0 %1717 }
 0x17c   : > { %1753 = vst.msk [vmem:[#allocation2 + $0x68] sm:$0xff] %vm1739_vm15, %v1718_v2  ;;  %v1002_v3 = vpop.permute.xlu1 %1001 }
 0x17d   : > { %1035 = vst.msk [vmem:[#allocation2 + $0x78] sm:$0xff] %vm1019_vm8, %v1002_v3 }
 0x17f   : > { %v1244_v58 = vpop.permute.xlu0 %1243  ;;  %v1768_v14 = vld [vmem:[#allocation2 + $0x60] sm:$0xff] }
 0x180   : > { %1278 = vst.msk [vmem:[#allocation2 + $0x70] sm:$0xff] %vm1263_vm9, %v1244_v58  ;;  %v1246_v56 = vpop.permute.xlu1 %1245  ;;  %2646 = vmatprep.mubr.msk.bf16.mxu1 %vm1792_vm0, %v1768_v14 }
 0x181   : > { %1279 = vst.msk [vmem:[#allocation2 + $0x78] sm:$0xff] %vm1263_vm9, %v1246_v56 }
 0x183   : > { %v1314_v63 = vpop.permute.xlu0 %1313  ;;  %v1769_v57 = vld [vmem:[#allocation2 + $0x68] sm:$0xff] }
 0x184   : > { %1348 = vst.msk [vmem:[#allocation2 + $0x70] sm:$0xff] %vm1333_vm10, %v1314_v63  ;;  %v1316_v29 = vpop.permute.xlu1 %1315  ;;  %2647 = vmatmul.mubr.msk.bf16.gmra.mrb[8].mxu1 %vm1792_vm0, %v1769_v57 }
 0x185   : > { %1349 = vst.msk [vmem:[#allocation2 + $0x78] sm:$0xff] %vm1333_vm10, %v1316_v29 }
 0x187   : > { %v1406_v12 = vpop.permute.xlu0 %1405 }
 0x188   : > { %1440 = vst.msk [vmem:[#allocation2 + $0x70] sm:$0xff] %vm1425_vm11, %v1406_v12  ;;  %v1408_v53 = vpop.permute.xlu1 %1407 }
 0x189   : > { %1441 = vst.msk [vmem:[#allocation2 + $0x78] sm:$0xff] %vm1425_vm11, %v1408_v53 }
 0x18b   : > { %v1482_v59 = vpop.permute.xlu0 %1481 }
 0x18c   : > { %1516 = vst.msk [vmem:[#allocation2 + $0x70] sm:$0xff] %vm1501_vm12, %v1482_v59  ;;  %v1484_v52 = vpop.permute.xlu1 %1483 }
 0x18d   : > { %1517 = vst.msk [vmem:[#allocation2 + $0x78] sm:$0xff] %vm1501_vm12, %v1484_v52 }
 0x18f   : > { %v1552_v35 = vpop.permute.xlu0 %1551 }
 0x190   : > { %1586 = vst.msk [vmem:[#allocation2 + $0x70] sm:$0xff] %vm1571_vm13, %v1552_v35  ;;  %v1554_v61 = vpop.permute.xlu1 %1553 }
 0x191   : > { %1587 = vst.msk [vmem:[#allocation2 + $0x78] sm:$0xff] %vm1571_vm13, %v1554_v61 }
 0x193   : > { %v1644_v27 = vpop.permute.xlu0 %1643 }
 0x194   : > { %1678 = vst.msk [vmem:[#allocation2 + $0x70] sm:$0xff] %vm1663_vm14, %v1644_v27  ;;  %v1646_v40 = vpop.permute.xlu1 %1645 }
 0x195   : > { %1679 = vst.msk [vmem:[#allocation2 + $0x78] sm:$0xff] %vm1663_vm14, %v1646_v40 }
 0x197   : > { %v1720_v13 = vpop.permute.xlu0 %1719  ;;  %v4008_v4 = vpop.f32.mrb[0].mxu0 }
 0x198   : > { %1754 = vst.msk [vmem:[#allocation2 + $0x70] sm:$0xff] %vm1739_vm15, %v1720_v13  ;;  %v1722_v41 = vpop.permute.xlu1 %1721  ;;  %v1879_v47 = vpop.f32.mrb[1].mxu0  ;;  %v2080_v43 = vmul.f32 %v4008_v4, %v4008_v4  ;;  %v2010_v55 = vsel %vm2006_vm1, %v4008_v4, 0.0 }
 0x199   : > { %1755 = vst.msk [vmem:[#allocation2 + $0x78] sm:$0xff] %vm1739_vm15, %v1722_v41  ;;  %v2078_v50 = vmul.f32 %v1879_v47, %v1879_v47  ;;  %v2625_v21 = vpop.f32.mrb[2].mxu0  ;;  %v2007_v22 = vsel %vm2006_vm1, %v1879_v47, 0.0 }
 0x19a   : > { %v1882_v6 = vpop.f32.mrb[3].mxu0  ;;  %v2081_v11 = vmul.f32 %v2625_v21, %v2625_v21  ;;  %v2113_v15 = vsel %vm2006_vm1, %v2080_v43, 0.0  ;;  %v2012_v8 = vsel %vm2006_vm1, %v2625_v21, 0.0 }
 0x19b   : > { %v2008_v32 = vsel %vm2006_vm1, %v1882_v6, 0.0  ;;  %v2079_v28 = vmul.f32 %v1882_v6, %v1882_v6  ;;  %v2110_v25 = vsel %vm2006_vm1, %v2078_v50, 0.0 }
 0x19c   : > { %v2009_v19 = vadd.f32 %v2008_v32, %v2007_v22  ;;  %v2115_v62 = vsel %vm2006_vm1, %v2081_v11, 0.0 }
 0x19d   : > { %v2111_v24 = vsel %vm2006_vm1, %v2079_v28, 0.0 }
 0x19e   : > { %v2011_v54 = vadd.f32 %v2010_v55, %v2009_v19  ;;  %v2112_v9 = vadd.f32 %v2111_v24, %v2110_v25 }
 0x19f   : > { %v1770_v48 = vld [vmem:[#allocation2 + $0x70] sm:$0xff] }
 0x1a0   : > { %v2114_v18 = vadd.f32 %v2113_v15, %v2112_v9  ;;  %2650 = vmatprep.mubr.msk.bf16.mxu1 %vm1792_vm0, %v1770_v48  ;;  %v1771_v60 = vld [vmem:[#allocation2 + $0x78] sm:$0xff]  ;;  %v2013_v23 = vadd.f32 %v2012_v8, %v2011_v54 }
 0x1a1   : > { %2651 = vmatmul.mubr.msk.bf16.gmra.mrb[12].mxu1 %vm1792_vm0, %v1771_v60 }
 0x1a2   : > { %v2116_v33 = vadd.f32 %v2115_v62, %v2114_v18 }
 0x1c8   : > { %v4025_v10 = vpop.f32.mrb[4].mxu0 }
 0x1c9   : > { %v4027_v17 = vpop.f32.mrb[5].mxu0  ;;  %v2084_v38 = vmul.f32 %v4025_v10, %v4025_v10  ;;  %v2018_v46 = vsel %vm2006_vm1, %v4025_v10, 0.0 }
 0x1ca   : > { %v2014_v51 = vsel %vm2006_vm1, %v4027_v17, 0.0  ;;  %v2082_v31 = vmul.f32 %v4027_v17, %v4027_v17  ;;  %v4033_v45 = vpop.f32.mrb[6].mxu0 }
 0x1cb   : > { %v2015_v34 = vadd.f32 %v2014_v51, %v2013_v23  ;;  %v4035_v30 = vpop.f32.mrb[7].mxu0  ;;  %v2085_v5 = vmul.f32 %v4033_v45, %v4033_v45  ;;  %v2121_v49 = vsel %vm2006_vm1, %v2084_v38, 0.0  ;;  %v2020_v37 = vsel %vm2006_vm1, %v4033_v45, 0.0 }
 0x1cc   : > { %v2117_v16 = vsel %vm2006_vm1, %v2082_v31, 0.0  ;;  %v2016_v44 = vsel %vm2006_vm1, %v4035_v30, 0.0  ;;  %v2083_v36 = vmul.f32 %v4035_v30, %v4035_v30 }
 0x1cd   : > { %v2118_v7 = vadd.f32 %v2117_v16, %v2116_v33  ;;  %v2017_v42 = vadd.f32 %v2016_v44, %v2015_v34  ;;  %v2123_v2 = vsel %vm2006_vm1, %v2085_v5, 0.0 }
 0x1ce   : > { %v2119_v20 = vsel %vm2006_vm1, %v2083_v36, 0.0 }
 0x1cf   : > { %v2019_v26 = vadd.f32 %v2018_v46, %v2017_v42  ;;  %v2120_v0 = vadd.f32 %v2119_v20, %v2118_v7 }
 0x1d1   : > { %v2122_v39 = vadd.f32 %v2121_v49, %v2120_v0  ;;  %v2021_v1 = vadd.f32 %v2020_v37, %v2019_v26 }
 0x1d3   : > { %v2124_v3 = vadd.f32 %v2123_v2, %v2122_v39 }
 0x1e8   : > { %v4053_v58 = vpop.f32.mrb[0].mxu1 }
 0x1e9   : > { %v2741_v14 = vpack.i.bf16 %v4053_v58, %v4008_v4  ;;  %v4057_v56 = vpop.f32.mrb[1].mxu1 }
 0x1ea   : > { %v2737_v63 = vpack.i.bf16 %v4057_v56, %v1879_v47  ;;  %v4060_v57 = vpop.f32.mrb[2].mxu1  ;;  %v2094_v49 = vmul.f32 %v4057_v56, %v4057_v56 }
 0x1eb   : > { %v2743_v29 = vpack.i.bf16 %v4060_v57, %v2625_v21  ;;  %v4063_v12 = vpop.f32.mrb[3].mxu1 }
 0x1ec   : > { %v2739_v53 = vpack.i.bf16 %v4063_v12, %v1882_v6  ;;  %2738 = vxpose.xlu0.b32.start [1/16] (narrow) %v2737_v63, 8 }
 0x1f0   : > { %2740 = vxpose.xlu0.b32.cont [2/16] (narrow) %v2739_v53, 8 }
 0x1f4   : > { %2742 = vxpose.xlu0.b32.cont [3/16] (narrow) %v2741_v14, 8  ;;  %v2095_v14 = vmul.f32 %v4063_v12, %v4063_v12 }
 0x1f8   : > { %2744 = vxpose.xlu0.b32.cont [4/16] (narrow) %v2743_v29, 8 }
 0x208   : > { %v4066_v59 = vpop.f32.mrb[8].mxu0 }
 0x209   : > { %v4068_v52 = vpop.f32.mrb[9].mxu0  ;;  %v2088_v4 = vmul.f32 %v4066_v59, %v4066_v59  ;;  %v2026_v43 = vsel %vm2006_vm1, %v4066_v59, 0.0 }
 0x20a   : > { %v2022_v35 = vsel %vm2006_vm1, %v4068_v52, 0.0  ;;  %v2086_v61 = vmul.f32 %v4068_v52, %v4068_v52  ;;  %v4074_v27 = vpop.f32.mrb[10].mxu0 }
 0x20b   : > { %v2023_v40 = vadd.f32 %v2022_v35, %v2021_v1  ;;  %v4076_v13 = vpop.f32.mrb[11].mxu0  ;;  %v2089_v22 = vmul.f32 %v4074_v27, %v4074_v27  ;;  %v2129_v55 = vsel %vm2006_vm1, %v2088_v4, 0.0  ;;  %v2028_v25 = vsel %vm2006_vm1, %v4074_v27, 0.0 }
 0x20c   : > { %v2125_v41 = vsel %vm2006_vm1, %v2086_v61, 0.0  ;;  %v2024_v47 = vsel %vm2006_vm1, %v4076_v13, 0.0  ;;  %v2087_v50 = vmul.f32 %v4076_v13, %v4076_v13  ;;  %v2096_v35 = vmul.f32 %v4053_v58, %v4053_v58 }
 0x20d   : > { %v2126_v21 = vadd.f32 %v2125_v41, %v2124_v3  ;;  %v2025_v6 = vadd.f32 %v2024_v47, %v2023_v40  ;;  %v2131_v54 = vsel %vm2006_vm1, %v2089_v22, 0.0  ;;  %v2038_v3 = vsel %vm2006_vm1, %v4057_v56, 0.0 }
 0x20e   : > { %v2127_v32 = vsel %vm2006_vm1, %v2087_v50, 0.0  ;;  %v2141_v61 = vsel %vm2006_vm1, %v2094_v49, 0.0  ;;  %v2040_v40 = vsel %vm2006_vm1, %v4063_v12, 0.0  ;;  %v2042_v56 = vsel %vm2006_vm1, %v4053_v58, 0.0 }
 0x20f   : > { %v2027_v28 = vadd.f32 %v2026_v43, %v2025_v6  ;;  %v2128_v19 = vadd.f32 %v2127_v32, %v2126_v21  ;;  %v2097_v47 = vmul.f32 %v4060_v57, %v4060_v57  ;;  %v2143_v50 = vsel %vm2006_vm1, %v2095_v14, 0.0 }
 0x210   : > { %v2145_v43 = vsel %vm2006_vm1, %v2096_v35, 0.0 }
 0x211   : > { %v2130_v11 = vadd.f32 %v2129_v55, %v2128_v19  ;;  %v2029_v24 = vadd.f32 %v2028_v25, %v2027_v28  ;;  %v2044_v28 = vsel %vm2006_vm1, %v4060_v57, 0.0  ;;  %v2147_v58 = vsel %vm2006_vm1, %v2097_v47, 0.0 }
 0x213   : > { %v2132_v9 = vadd.f32 %v2131_v54, %v2130_v11 }
 0x228   : > { %v4094_v15 = vpop.f32.mrb[4].mxu1 }
 0x229   : > { %v2749_v8 = vpack.i.bf16 %v4094_v15, %v4025_v10  ;;  %v1959_v48 = vpop.f32.mrb[5].mxu1  ;;  %v2100_v57 = vmul.f32 %v4094_v15, %v4094_v15 }
 0x22a   : > { %v2745_v18 = vpack.i.bf16 %v1959_v48, %v4027_v17  ;;  %v4099_v60 = vpop.f32.mrb[6].mxu1  ;;  %v2098_v22 = vmul.f32 %v1959_v48, %v1959_v48 }
 0x22b   : > { %v2751_v23 = vpack.i.bf16 %v4099_v60, %v4033_v45  ;;  %v4103_v62 = vpop.f32.mrb[7].mxu1 }
 0x22c   : > { %v2747_v33 = vpack.i.bf16 %v4103_v62, %v4035_v30  ;;  %2746 = vxpose.xlu0.b32.cont [5/16] (narrow) %v2745_v18, 8  ;;  %v2099_v25 = vmul.f32 %v4103_v62, %v4103_v62 }
 0x230   : > { %2748 = vxpose.xlu0.b32.cont [6/16] (narrow) %v2747_v33, 8 }
 0x234   : > { %2750 = vxpose.xlu0.b32.cont [7/16] (narrow) %v2749_v8, 8 }
 0x238   : > { %2752 = vxpose.xlu0.b32.cont [8/16] (narrow) %v2751_v23, 8  ;;  %v2149_v23 = vsel %vm2006_vm1, %v2098_v22, 0.0 }
 0x247   : > { %v4107_v51 = vpop.f32.mrb[12].mxu0 }
 0x248   : > { %v4109_v10 = vpop.f32.mrb[13].mxu0  ;;  %v2092_v30 = vmul.f32 %v4107_v51, %v4107_v51  ;;  %v2034_v46 = vsel %vm2006_vm1, %v4107_v51, 0.0 }
 0x249   : > { %v2030_v17 = vsel %vm2006_vm1, %v4109_v10, 0.0  ;;  %v2090_v31 = vmul.f32 %v4109_v10, %v4109_v10  ;;  %v4115_v45 = vpop.f32.mrb[14].mxu0 }
 0x24a   : > { %v2031_v34 = vadd.f32 %v2030_v17, %v2029_v24  ;;  %v4117_v38 = vpop.f32.mrb[15].mxu0  ;;  %v2093_v5 = vmul.f32 %v4115_v45, %v4115_v45  ;;  %v2137_v37 = vsel %vm2006_vm1, %v2092_v30, 0.0  ;;  %v2036_v39 = vsel %vm2006_vm1, %v4115_v45, 0.0 }
 0x24b   : > { %v2133_v16 = vsel %vm2006_vm1, %v2090_v31, 0.0  ;;  %v2032_v44 = vsel %vm2006_vm1, %v4117_v38, 0.0  ;;  %v2091_v36 = vmul.f32 %v4117_v38, %v4117_v38  ;;  %v2048_v17 = vsel %vm2006_vm1, %v4103_v62, 0.0 }
 0x24c   : > { %v2134_v7 = vadd.f32 %v2133_v16, %v2132_v9  ;;  %v2033_v42 = vadd.f32 %v2032_v44, %v2031_v34  ;;  %v2139_v63 = vsel %vm2006_vm1, %v2093_v5, 0.0  ;;  %v2046_v9 = vsel %vm2006_vm1, %v1959_v48, 0.0 }
 0x24d   : > { %v2135_v20 = vsel %vm2006_vm1, %v2091_v36, 0.0  ;;  %v2101_v48 = vmul.f32 %v4099_v60, %v4099_v60  ;;  %v2151_v34 = vsel %vm2006_vm1, %v2099_v25, 0.0  ;;  %v2050_v16 = vsel %vm2006_vm1, %v4094_v15, 0.0 }
 0x24e   : > { %v2035_v26 = vadd.f32 %v2034_v46, %v2033_v42  ;;  %v2136_v0 = vadd.f32 %v2135_v20, %v2134_v7  ;;  %v2153_v36 = vsel %vm2006_vm1, %v2100_v57, 0.0  ;;  %v2052_v62 = vsel %vm2006_vm1, %v4099_v60, 0.0 }
 0x250   : > { %v2037_v1 = vadd.f32 %v2036_v39, %v2035_v26  ;;  %v2138_v2 = vadd.f32 %v2137_v37, %v2136_v0 }
 0x252   : > { %v2039_v29 = vadd.f32 %v2038_v3, %v2037_v1  ;;  %v2140_v53 = vadd.f32 %v2139_v63, %v2138_v2 }
 0x254   : > { %v2041_v4 = vadd.f32 %v2040_v40, %v2039_v29  ;;  %v2142_v41 = vadd.f32 %v2141_v61, %v2140_v53 }
 0x256   : > { %v2043_v21 = vadd.f32 %v2042_v56, %v2041_v4  ;;  %v2144_v6 = vadd.f32 %v2143_v50, %v2142_v41 }
 0x257   : > { %v2648_v32 = vpop.f32.mrb[8].mxu1 }
 0x258   : > { %v2146_v12 = vadd.f32 %v2145_v43, %v2144_v6  ;;  %v2757_v19 = vpack.i.bf16 %v2648_v32, %v4066_v59  ;;  %v1975_v55 = vpop.f32.mrb[9].mxu1  ;;  %v2045_v24 = vadd.f32 %v2044_v28, %v2043_v21  ;;  %v2104_v0 = vmul.f32 %v2648_v32, %v2648_v32 }
 0x259   : > { %v2753_v11 = vpack.i.bf16 %v1975_v55, %v4068_v52  ;;  %v2649_v54 = vpop.f32.mrb[10].mxu1  ;;  %v2054_v20 = vsel %vm2006_vm1, %v1975_v55, 0.0  ;;  %v2058_v3 = vsel %vm2006_vm1, %v2648_v32, 0.0 }
 0x25a   : > { %v2148_v8 = vadd.f32 %v2147_v58, %v2146_v12  ;;  %v1978_v18 = vpop.f32.mrb[11].mxu1  ;;  %v2047_v59 = vadd.f32 %v2046_v9, %v2045_v24  ;;  %v2759_v33 = vpack.i.bf16 %v2649_v54, %v4074_v27  ;;  %v2102_v27 = vmul.f32 %v1975_v55, %v1975_v55 }
 0x25b   : > { %2754 = vxpose.xlu0.b32.cont [9/16] (narrow) %v2753_v11, 8  ;;  %v2755_v52 = vpack.i.bf16 %v1978_v18, %v4076_v13  ;;  %v2155_v13 = vsel %vm2006_vm1, %v2101_v48, 0.0  ;;  %v2103_v5 = vmul.f32 %v1978_v18, %v1978_v18  ;;  %v2056_v39 = vsel %vm2006_vm1, %v1978_v18, 0.0 }
 0x25c   : > { %v2150_v31 = vadd.f32 %v2149_v23, %v2148_v8  ;;  %v2049_v30 = vadd.f32 %v2048_v17, %v2047_v59  ;;  %v2157_v15 = vsel %vm2006_vm1, %v2102_v27, 0.0  ;;  %v2105_v1 = vmul.f32 %v2649_v54, %v2649_v54 }
 0x25d   : > { %v2159_v2 = vsel %vm2006_vm1, %v2103_v5, 0.0  ;;  %v2161_v63 = vsel %vm2006_vm1, %v2104_v0, 0.0  ;;  %v2060_v53 = vsel %vm2006_vm1, %v2649_v54, 0.0 }
 0x25e   : > { %v2152_v44 = vadd.f32 %v2151_v34, %v2150_v31  ;;  %v2051_v7 = vadd.f32 %v2050_v16, %v2049_v30  ;;  %v2163_v61 = vsel %vm2006_vm1, %v2105_v1, 0.0 }
 0x25f   : > { %2756 = vxpose.xlu0.b32.cont [10/16] (narrow) %v2755_v52, 8 }
 0x260   : > { %v2154_v42 = vadd.f32 %v2153_v36, %v2152_v44  ;;  %v2053_v46 = vadd.f32 %v2052_v62, %v2051_v7 }
 0x262   : > { %v2156_v26 = vadd.f32 %v2155_v13, %v2154_v42  ;;  %v2055_v49 = vadd.f32 %v2054_v20, %v2053_v46 }
 0x263   : > { %2758 = vxpose.xlu0.b32.cont [11/16] (narrow) %v2757_v19, 8 }
 0x264   : > { %v2158_v37 = vadd.f32 %v2157_v15, %v2156_v26  ;;  %v2057_v60 = vadd.f32 %v2056_v39, %v2055_v49 }
 0x266   : > { %v2160_v14 = vadd.f32 %v2159_v2, %v2158_v37  ;;  %v2059_v29 = vadd.f32 %v2058_v3, %v2057_v60 }
 0x267   : > { %2760 = vxpose.xlu0.b32.cont [12/16] (narrow) %v2759_v33, 8 }
 0x268   : > { %v2162_v35 = vadd.f32 %v2161_v63, %v2160_v14  ;;  %v2061_v40 = vadd.f32 %v2060_v53, %v2059_v29 }
 0x26a   : > { %v2164_v4 = vadd.f32 %v2163_v61, %v2162_v35 }
 0x274   : > { %v2652_v41 = vpop.f32.mrb[12].mxu1 }
 0x275   : > { %v2765_v56 = vpack.i.bf16 %v2652_v41, %v4107_v51  ;;  %v1991_v47 = vpop.f32.mrb[13].mxu1  ;;  %v2108_v22 = vmul.f32 %v2652_v41, %v2652_v41  ;;  %v2066_v24 = vsel %vm2006_vm1, %v2652_v41, 0.0 }
 0x276   : > { %v2062_v50 = vsel %vm2006_vm1, %v1991_v47, 0.0  ;;  %v2106_v21 = vmul.f32 %v1991_v47, %v1991_v47  ;;  %v2761_v6 = vpack.i.bf16 %v1991_v47, %v4109_v10  ;;  %v2653_v43 = vpop.f32.mrb[14].mxu1 }
 0x277   : > { %v2063_v32 = vadd.f32 %v2062_v50, %v2061_v40  ;;  %v1994_v28 = vpop.f32.mrb[15].mxu1  ;;  %v2767_v19 = vpack.i.bf16 %v2653_v43, %v4115_v45  ;;  %v2109_v10 = vmul.f32 %v2653_v43, %v2653_v43  ;;  %v2169_v18 = vsel %vm2006_vm1, %v2108_v22, 0.0 }
 0x278   : > { %v2165_v12 = vsel %vm2006_vm1, %v2106_v21, 0.0  ;;  %v2064_v55 = vsel %vm2006_vm1, %v1994_v28, 0.0  ;;  %v2107_v58 = vmul.f32 %v1994_v28, %v1994_v28  ;;  %2762 = vxpose.xlu0.b32.cont [13/16] (narrow) %v2761_v6, 8  ;;  %v2763_v51 = vpack.i.bf16 %v1994_v28, %v4117_v38 }
 0x279   : > { %v2166_v25 = vadd.f32 %v2165_v12, %v2164_v4  ;;  %v2065_v11 = vadd.f32 %v2064_v55, %v2063_v32  ;;  %v2068_v45 = vsel %vm2006_vm1, %v2653_v43, 0.0  ;;  %v2171_v38 = vsel %vm2006_vm1, %v2109_v10, 0.0 }
 0x27a   : > { %v2167_v54 = vsel %vm2006_vm1, %v2107_v58, 0.0 }
 0x27b   : > { %v2067_v9 = vadd.f32 %v2066_v24, %v2065_v11  ;;  %v2168_v8 = vadd.f32 %v2167_v54, %v2166_v25 }
 0x27c   : > { %2764 = vxpose.xlu0.b32.cont [14/16] (narrow) %v2763_v51, 8 }
 0x27d   : > { %v2069_v57 = vadd.f32 %v2068_v45, %v2067_v9  ;;  %v2170_v23 = vadd.f32 %v2169_v18, %v2168_v8 }
 0x27f   : > { %v2070_v59 = vrot.slane %v2069_v57, 4  ;;  %v2172_v33 = vadd.f32 %v2171_v38, %v2170_v23 }
 0x280   : > { %2766 = vxpose.xlu0.b32.cont [15/16] (narrow) %v2765_v56, 8 }
 0x281   : > { %v2071_v17 = vadd.f32 %v2070_v59, %v2069_v57  ;;  %v2173_v31 = vrot.slane %v2172_v33, 4 }
 0x283   : > { %v2072_v52 = vrot.slane %v2071_v17, 2  ;;  %v2174_v48 = vadd.f32 %v2173_v31, %v2172_v33 }
 0x284   : > { %2768 = vxpose.xlu0.b32.end [16/16] (narrow) %v2767_v19, 8 }
 0x285   : > { %v2175_v34 = vrot.slane %v2174_v48, 2  ;;  %v2073_v30 = vadd.f32 %v2072_v52, %v2071_v17 }
 0x287   : > { %v2074_v16 = vrot.slane %v2073_v30, 1  ;;  %v2176_v44 = vadd.f32 %v2175_v34, %v2174_v48 }
 0x289   : > { %v2075_v36 = vadd.f32 %v2074_v16, %v2073_v30  ;;  %v2177_v27 = vrot.slane %v2176_v44, 1 }
 0x28b   : > { %2077 = vst.msk [vmem:[%s324_s14] sm:$0x1] %vm2076_vm2, %v2075_v36  ;;  %v2178_v7 = vadd.f32 %v2177_v27, %v2176_v44 }
 0x28c   : > { %2806 = shalt.err (!%p2803_p5)
}
 0x28d   : > { %s2807_s13 = scalar_lea.hbm %s4211_s11, 16  ;;  %s2811_s8 = scalar_lea.hbm %s4332_s4, 32 }
 0x28e   : > { %p2808_p6 = scmp.ne.s32.totalorder %s4211_s11, %s2807_s13  ;;  %p2812_p10 = scmp.lt.u32.totalorder %s4211_s11, %s4332_s4 }
 0x28f   : > { %p2813_p11 = scmp.lt.u32.totalorder %s2811_s8, %s2807_s13  ;;  %p2815_p13 = scmp.lt.u32.totalorder %s2807_s13, %s4211_s11 }
 0x290   : > { %p2809_p7 = pnand %p2808_p6, %p3016_p4 }
 0x291   : > { %p2814_p12 = por %p2813_p11, %p2812_p10 }
 0x292   : > { %p2810_p9 = pneg %p2809_p7 }
 0x293   : > { %p2816_p0 = por %p2815_p13, %p2814_p12 }
 0x295   : > { %p2817_p1 = pnand %p2816_p0, %p2810_p9 }
 0x297   : > { %2820 = shalt.err (!%p2817_p1)
}
 0x298   : > { %2665 = dma.vmem_to_hbm [thread:$0]  (%p3016_p4), %s4213_s15, 16, %s4211_s11, %s2259_s29  }
 0x299   : > { %s4352_s27 = scalar_lea.vmem [#allocation7], %s4197_s7  ;;  %s2821_s10 = scalar_lea.vmem %s4221_s9, 16 }
 0x29a   : > { %2179 = vst.msk [vmem:[%s4352_s27] sm:$0x1] %vm2076_vm2, %v2178_v7  ;;  %p2822_p2 = scmp.ne.s32.totalorder %s4221_s9, %s2821_s10  ;;  %s2942_s13 = smov [#allocation7]  }
 0x29b   : > { %s2825_s14 = sshll.u32 %s2942_s13, 4  ;;  %s2826_s14 = int_to_ptr.vmem [resolvable:$false] %s2825_s14 }
 0x29c   : > { %p2823_p3 = pnand %p2822_p2, %p3016_p4  ;;  %s2827_s24 = scalar_lea.vmem %s2826_s14, 32 }
 0x29d   : > { %p2828_p6 = scmp.lt.s32.totalorder %s4221_s9, %s2826_s14  ;;  %p2829_p7 = scmp.lt.s32.totalorder %s2827_s24, %s2821_s10 }
 0x29e   : > { %p2824_p5 = pneg %p2823_p3 }
 0x29f   : > { %p2830_p9 = por %p2829_p7, %p2828_p6 }
 0x2a1   : > { %p2831_p10 = pnand %p2830_p9, %p2824_p5 }
 0x2a3   : > { %2834 = shalt.err (!%p2831_p10)
}
 0x2a4   : > { %s2835_s15 = scalar_lea.hbm %s4219_s17, 16  ;;  %s2839_s16 = scalar_lea.hbm %s4333_s5, 32 }
 0x2a5   : > { %p2836_p11 = scmp.ne.s32.totalorder %s4219_s17, %s2835_s15  ;;  %p2840_p0 = scmp.lt.u32.totalorder %s4219_s17, %s4333_s5 }
 0x2a6   : > { %p2841_p1 = scmp.lt.u32.totalorder %s2839_s16, %s2835_s15  ;;  %p2843_p3 = scmp.lt.u32.totalorder %s2835_s15, %s4219_s17 }
 0x2a7   : > { %p2837_p12 = pnand %p2836_p11, %p3016_p4 }
 0x2a8   : > { %p2842_p2 = por %p2841_p1, %p2840_p0 }
 0x2a9   : > { %p2838_p13 = pneg %p2837_p12 }
 0x2aa   : > { %p2844_p5 = por %p2843_p3, %p2842_p2 }
 0x2ac   : > { %p2845_p6 = pnand %p2844_p5, %p2838_p13 }
 0x2ae   : > { %2848 = shalt.err (!%p2845_p6)
}
 0x2af   : > { %2666 = dma.vmem_to_hbm [thread:$0]  (%p3016_p4), %s4221_s9, 16, %s4219_s17, %s2259_s29  }
 0x2b0   : > { %s2493_s10 = sshll.u32 %s4197_s7, 3  ;;  %s2596_s13 = sshll.u32 %s2923_s21, 7 }
 0x2b1   : > { %s318_s14 = scalar_lea.vmem [#allocation3], %s2493_s10  ;;  %s4278_s8 = scalar_lea.hbm %s4331_s3, %s2596_s13 }
 0x2b2   : > { %s2280_s24 = sshll.u32 %s318_s14, 4  ;;  %s2254_s12 = scalar_lea.sflag [#allocation4], %s4197_s7  ;;  %s4280_s24 = int_to_ptr.vmem [resolvable:$true] %s2280_s24 }
 0x2b3   : > { %s2849_s9 = scalar_lea.vmem %s4280_s24, 128  ;;  %s2943_s21 = smov [#allocation3]  }
 0x2b4   : > { %p2850_p7 = scmp.ne.s32.totalorder %s4280_s24, %s2849_s9  ;;  %s2853_s17 = sshll.u32 %s2943_s21, 4  ;;  %s2854_s17 = int_to_ptr.vmem [resolvable:$false] %s2853_s17 }
 0x2b5   : > { %s2855_s29 = scalar_lea.vmem %s2854_s17, 256  ;;  %p2856_p11 = scmp.lt.s32.totalorder %s4280_s24, %s2854_s17 }
 0x2b6   : > { %p2851_p9 = pnand %p2850_p7, %p3016_p4  ;;  %p2857_p12 = scmp.lt.s32.totalorder %s2855_s29, %s2849_s9 }
 0x2b8   : > { %p2852_p10 = pneg %p2851_p9  ;;  %p2858_p13 = por %p2857_p12, %p2856_p11 }
 0x2ba   : > { %p2859_p0 = pnand %p2858_p13, %p2852_p10 }
 0x2c8   : > { %v2769_v62 = vpop.trf.xlu0 }
 0x2c9   : > { %v2773_v42 = vunpack.i.h.bf16 %v2769_v62  ;;  %v2770_v13 = vunpack.i.l.bf16 %v2769_v62 }
 0x2cb   : > { %v2595_v46 = vpack.c.bf16 %v2773_v42, %v2770_v13 }
 0x2cd   : > { %2252 = vst [vmem:[%s318_s14] sm:$0xff] %v2595_v46 }
 0x2ce   : > { %2862 = shalt.err (!%p2859_p0)
}
 0x2cf   : > { %s2863_s7 = scalar_lea.hbm %s4278_s8, 128  ;;  %s2867_s27 = scalar_lea.hbm %s4331_s3, 256 }
 0x2d0   : > { %p2864_p1 = scmp.ne.s32.totalorder %s4278_s8, %s2863_s7  ;;  %p2868_p5 = scmp.lt.u32.totalorder %s4278_s8, %s4331_s3 }
 0x2d1   : > { %p2869_p6 = scmp.lt.u32.totalorder %s2867_s27, %s2863_s7  ;;  %p2871_p9 = scmp.lt.u32.totalorder %s2863_s7, %s4278_s8 }
 0x2d2   : > { %p2865_p2 = pnand %p2864_p1, %p3016_p4 }
 0x2d3   : > { %p2870_p7 = por %p2869_p6, %p2868_p5 }
 0x2d4   : > { %p2866_p3 = pneg %p2865_p2 }
 0x2d5   : > { %p2872_p10 = por %p2871_p9, %p2870_p7 }
 0x2d7   : > { %p2873_p11 = pnand %p2872_p10, %p2866_p3 }
 0x2d9   : > { %2876 = shalt.err (!%p2873_p11)
}
 0x2da   : > { %2664 = dma.vmem_to_hbm [thread:$0]  (%p3016_p4), %s4280_s24, 128, %s4278_s8, %s2254_s12  }
 0x2db PF: > { %p2680_p12 = scmp.ge.s32.totalorder %s2931_s23, 2  ;;  %s2322_s14 = sand.u32 1, %s2911_s18  }
 0x2dc   : > { %s2323_s15 = scalar_lea.sflag [#allocation4], %s2322_s14 }
 0x2dd   : > { %p2671_p13 = pnand %p2680_p12, %p3025_p8 }
 0x2df   : > { %2902 = dma.done.wait (!%p2671_p13), %s2323_s15, 128  }
 0x2e0   : > { %2904 = vsyncadd (!%p2671_p13), %s2323_s15, 4294967168  ;;  %s4353_s11 = sadd.s32 4294967294, %s2931_s23  }
 0x2e1   : > { %s2331_s9 = sand.u32 1, %s4353_s11  }
 0x2e2   : > { %s2332_s21 = scalar_lea.sflag [#allocation6], %s2331_s9 }
 0x2e3   : > { %2906 = dma.done.wait (!%p2671_p13), %s2332_s21, 32  }
 0x2e4   : > { %2908 = vsyncadd (!%p2671_p13), %s2332_s21, 4294967264  ;;  %s22_s23 = sadd.s32 1, %s2931_s23   ;;  %s4354_s18 = smov %s2915_s19 }
 0x2e5   : > { %p19_p4 = scmp.ge.s32.totalorder %s22_s23, 4   ;;  %s4355_s19 = smov %s2919_s20 }
 0x2e6   : > { %s4356_s20 = smov %s3031_s6  ;;  %s4357_s21 = smov %s2927_s22 }
 0x2e7   : > { %s4358_s22 = smov %s4360_s26  ;;  %21 = sbr.rel (!%p19_p4) target bundleno = 6 (0x6), region = 105 }
 0x2ee   :  { %2344 = vsyncpa [#allocation4], 1 }
 0x2ef   :  { %2346 = vsyncpa [#allocation4 + $0x1], 1 }
 0x2f0   :  { %2347 = vsyncpa [#allocation6], 1 }
 0x2f1   :  { %2349 = vsyncpa [#allocation6 + $0x1], 1 }

</bundles_post_ra>
